<compile_context>
chip_gen: v7x
topology: tpu7x:2x2x1
jax: 0.10.0
libtpu: 0.0.40
codegen_flags: <defaults>
</compile_context>

<pallas_src>
import jax
import jax.numpy as jnp
from jax.experimental import pallas as pl
from jax.experimental.pallas import tpu as pltpu

IN_FEATURES = 784
HIDDEN = 512
OUT_FEATURES = 10
OUT_PAD = 128         # lane-dense fc2 output / store


def _round_up(x, m):
    return ((x + m - 1) // m) * m


def net_kernel(x_ref, w1_ref, b1_ref, w2_ref, b2_ref, o_ref):
    # x:  [TB, 784] (native dtype)   w1: [784, 512] (bf16)   b1: [1, 512] (f32)
    # w2: [512, 128] (bf16)          b2: [1, 128]   (f32)    o:  [TB, 128]
    # In-kernel cast to the MXU streaming dtype (VPU op, hidden under DMA/MXU).
    x = x_ref[...].astype(w1_ref.dtype)

    # fc1 + bias + ReLU (f32 accumulation, f32 elementwise).
    h = jnp.dot(x, w1_ref[...], preferred_element_type=jnp.float32) + b1_ref[...]
    h = jnp.maximum(h, 0.0)

    # dropout(0.5): identity in eval/inference mode.

    # fc2 (bf16 streaming, f32 accumulation). Padded output columns carry a
    # -1e30 bias so they vanish under softmax.
    logits = (
        jnp.dot(h.astype(w2_ref.dtype), w2_ref[...],
                preferred_element_type=jnp.float32)
        + b2_ref[...]
    )

    # Numerically stable log_softmax over the padded 128-lane block.
    m = jnp.max(logits, axis=-1, keepdims=True)
    shifted = logits - m
    lse = jnp.log(jnp.sum(jnp.exp(shifted), axis=-1, keepdims=True))
    o_ref[...] = (shifted - lse).astype(o_ref.dtype)


def prepare_params(w1, b1, w2, b2, compute_dtype=jnp.bfloat16):
    """One-time param prep: transpose to (in, out), pad fc2 out to 128 lanes, cast.

    w1: (512, 784)  b1: (512,)  w2: (10, 512)  b2: (10,)   [PyTorch layout]
    """
    w1t = w1.T.astype(compute_dtype)                       # (784, 512), no K padding
    b1_row = b1.reshape(1, HIDDEN).astype(jnp.float32)

    w2t = jnp.zeros((HIDDEN, OUT_PAD), dtype=compute_dtype)
    w2t = w2t.at[:, :OUT_FEATURES].set(w2.T.astype(compute_dtype))
    # Large-negative bias on padded logit columns so log_softmax ignores them.
    b2_row = jnp.full((1, OUT_PAD), -1e30, dtype=jnp.float32)
    b2_row = b2_row.at[0, :OUT_FEATURES].set(b2.astype(jnp.float32))
    return w1t, b1_row, w2t, b2_row


def _default_block_b():
    """1024 on older/low-BW parts, 2048 on v6e/v7x (bigger tiles amortize step overhead)."""
    try:
        kind = jax.devices()[0].device_kind.lower()
    except Exception:
        return 1024
    if ("v5" in kind) or ("v4" in kind) or ("v3" in kind):
        return 1024
    return 2048


def _pick_batch_tile(B8, block_b):
    """Batch tile with >=2 grid steps (>=4 for big batches) so the 'parallel'
    batch axis shards across both TensorCores on v7x and the x DMA pipelines
    against compute."""
    if B8 >= 4 * 256:
        cap = _round_up(pl.cdiv(B8, 4), 256)   # >= 4 steps, 256-aligned tiles
    elif B8 >= 16:
        cap = _round_up(pl.cdiv(B8, 2), 8)     # >= 2 steps
    else:
        cap = B8                               # tiny batch: single tile
    return max(8, min(block_b, B8, cap))


def net_forward(x_nchw, w1t, b1_row, w2t, b2_row, *, block_b=None,
                out_dtype=jnp.bfloat16):
    """x_nchw: [B, 1, 28, 28]. Params from prepare_params. Returns [B, 10] log-probs."""
    B = x_nchw.shape[0]
    if block_b is None:
        block_b = _default_block_b()

    # torch.flatten(x, 1): metadata-only reshape; NO dtype cast / K pad here.
    x2d = x_nchw.reshape(B, -1)
    assert x2d.shape[1] == IN_FEATURES

    # Only pad to an 8-row multiple when needed (tiny copy for odd batches);
    # tiles that don't divide B8 are handled by Pallas partial blocks.
    B8 = _round_up(B, 8)
    if B8 != B:
        x2d = jnp.pad(x2d, ((0, B8 - B), (0, 0)))

    TB = _pick_batch_tile(B8, block_b)
    grid = (pl.cdiv(B8, TB),)

    # Explicit VMEM budget: double-buffered x/out tiles + weights (counted x2 to
    # also cover the Buffered(1) fallback), plus ~25% + 2 MiB headroom.
    out_itemsize = jnp.dtype(out_dtype).itemsize
    w_itemsize = jnp.dtype(w1t.dtype).itemsize
    vmem_bytes = (
        2 * TB * IN_FEATURES * x2d.dtype.itemsize
        + 2 * TB * OUT_PAD * out_itemsize
        + 2 * (IN_FEATURES * HIDDEN + HIDDEN * OUT_PAD) * w_itemsize
        + 2 * (HIDDEN + OUT_PAD) * 4
    )
    vmem_bytes = int(vmem_bytes * 1.25) + (2 << 20)
    vmem_bytes = min(max(vmem_bytes, 16 << 20), 64 << 20)

    def build(single_buffer_weights):
        wmode = {"pipeline_mode": pl.Buffered(1)} if single_buffer_weights else {}
        return pl.pallas_call(
            net_kernel,
            out_shape=jax.ShapeDtypeStruct((B8, OUT_PAD), out_dtype),
            grid_spec=pltpu.PrefetchScalarGridSpec(
                num_scalar_prefetch=0,
                grid=grid,
                in_specs=[
                    # x: one batch tile per grid step (double-buffered by Pallas).
                    # 784 == full last dim, so no (8,128) issue and no K pad.
                    pl.BlockSpec((TB, IN_FEATURES), lambda i: (i, 0)),
                    # Weights/biases: constant index -> DMA'd once, VMEM-resident,
                    # single-buffered (no point double-buffering constants).
                    pl.BlockSpec((IN_FEATURES, HIDDEN), lambda i: (0, 0), **wmode),
                    pl.BlockSpec((1, HIDDEN), lambda i: (0, 0), **wmode),
                    pl.BlockSpec((HIDDEN, OUT_PAD), lambda i: (0, 0), **wmode),
                    pl.BlockSpec((1, OUT_PAD), lambda i: (0, 0), **wmode),
                ],
                out_specs=pl.BlockSpec((TB, OUT_PAD), lambda i: (i, 0)),
            ),
            compiler_params=pltpu.CompilerParams(
                dimension_semantics=("parallel",),   # batch axis -> both TCs on v7x
                vmem_limit_bytes=vmem_bytes,
            ),
        )

    try:
        out_padded = build(True)(x2d, w1t, b1_row, w2t, b2_row)
    except Exception:
        # TODO(synk): pl.Buffered(1) unsupported on this jax version; fall back to
        # default double-buffered weight blocks (slightly more VMEM, same result).
        out_padded = build(False)(x2d, w1t, b1_row, w2t, b2_row)

    return out_padded[:B, :OUT_FEATURES]


def init_params(key):
    """Deterministic PyTorch-style Linear init: U(-1/sqrt(fan_in), 1/sqrt(fan_in))."""
    k1, k2, k3, k4 = jax.random.split(key, 4)
    bound1 = 1.0 / jnp.sqrt(784.0)
    bound2 = 1.0 / jnp.sqrt(512.0)
    w1 = jax.random.uniform(k1, (512, 784), jnp.float32, -bound1, bound1)
    b1 = jax.random.uniform(k2, (512,), jnp.float32, -bound1, bound1)
    w2 = jax.random.uniform(k3, (10, 512), jnp.float32, -bound2, bound2)
    b2 = jax.random.uniform(k4, (10,), jnp.float32, -bound2, bound2)
    return w1, b1, w2, b2


if __name__ == "__main__":
    key = jax.random.PRNGKey(0)
    kx, kp = jax.random.split(key)

    B = 8
    x = jax.random.normal(kx, (B, 1, 28, 28), jnp.float32)  # NCHW MNIST-like input
    w1, b1, w2, b2 = init_params(kp)

    # One-time parameter preparation (transpose + pad fc2 out + bf16 cast).
    w1t, b1_row, w2t, b2_row = prepare_params(w1, b1, w2, b2)

    out = net_forward(x, w1t, b1_row, w2t, b2_row)
    out = jax.block_until_ready(out)
    assert out.shape == (B, 10)

    # Full-precision reference — semantic check; tolerance covers bf16 weight /
    # activation streaming (f32 accumulation) and the bf16 output format.
    ref_h = jnp.maximum(x.reshape(B, -1) @ w1.T + b1, 0.0)
    ref_logits = ref_h @ w2.T + b2
    ref = jax.nn.log_softmax(ref_logits, axis=1)
    err = jnp.max(jnp.abs(out.astype(jnp.float32) - ref))
    assert err < 6e-2, f"max abs err = {err}"

    print("KERNEL_OK")
</pallas_src>

<mosaic_0001>
module attributes {stable_mosaic.version = 11 : i64} {
  func.func @net_kernel(%arg0: i32, %arg1: memref<8x784xf32, #tpu.memory_space<vmem>>, %arg2: memref<784x512xbf16, #tpu.memory_space<vmem>>, %arg3: memref<1x512xf32, #tpu.memory_space<vmem>>, %arg4: memref<512x128xbf16, #tpu.memory_space<vmem>>, %arg5: memref<1x128xf32, #tpu.memory_space<vmem>>, %arg6: memref<8x128xbf16, #tpu.memory_space<vmem>>) attributes {dimension_semantics = [#tpu.dimension_semantics<parallel>], iteration_bounds = array<i64: 1>, scalar_prefetch = 0 : i64, scratch_operands = 0 : i64, tpu.core_type = #tpu.core_type<tc>, window_params = [{transform_indices = @transform_0, window_bounds = array<i64: 8, 784>}, {pipeline_mode = #tpu.pipeline_mode<synchronous>, transform_indices = @transform_1, window_bounds = array<i64: 784, 512>}, {pipeline_mode = #tpu.pipeline_mode<synchronous>, transform_indices = @transform_2, window_bounds = array<i64: 1, 512>}, {pipeline_mode = #tpu.pipeline_mode<synchronous>, transform_indices = @transform_3, window_bounds = array<i64: 512, 128>}, {pipeline_mode = #tpu.pipeline_mode<synchronous>, transform_indices = @transform_4, window_bounds = array<i64: 1, 128>}, {transform_indices = @transform_5, window_bounds = array<i64: 8, 128>}]} {
    %c0 = arith.constant 0 : index
    %c0_0 = arith.constant 0 : index
    %0 = vector.load %arg1[%c0, %c0_0] : memref<8x784xf32, #tpu.memory_space<vmem>>, vector<8x784xf32>
    %1 = arith.truncf %0 : vector<8x784xf32> to vector<8x784xbf16>
    %c0_1 = arith.constant 0 : index
    %c0_2 = arith.constant 0 : index
    %2 = vector.load %arg2[%c0_1, %c0_2] : memref<784x512xbf16, #tpu.memory_space<vmem>>, vector<784x512xbf16>
    %cst = arith.constant dense<0.000000e+00> : vector<8x512xf32>
    %3 = tpu.matmul %1, %2, %cst {dimension_numbers = #tpu.dot_dimension_numbers<[1], [0], [0], [1], [0, 0, 1, 1], [], []>} : vector<8x784xbf16>, vector<784x512xbf16>, vector<8x512xf32> -> vector<8x512xf32>
    %c0_3 = arith.constant 0 : index
    %c0_4 = arith.constant 0 : index
    %4 = vector.load %arg3[%c0_3, %c0_4] : memref<1x512xf32, #tpu.memory_space<vmem>>, vector<1x512xf32>
    %5 = vector.broadcast %4 : vector<1x512xf32> to vector<8x512xf32>
    %6 = arith.addf %3, %5 : vector<8x512xf32>
    %cst_5 = arith.constant 0.000000e+00 : f32
    %7 = vector.broadcast %cst_5 : f32 to vector<8x512xf32>
    %8 = arith.maximumf %6, %7 : vector<8x512xf32>
    %9 = arith.truncf %8 : vector<8x512xf32> to vector<8x512xbf16>
    %c0_6 = arith.constant 0 : index
    %c0_7 = arith.constant 0 : index
    %10 = vector.load %arg4[%c0_6, %c0_7] : memref<512x128xbf16, #tpu.memory_space<vmem>>, vector<512x128xbf16>
    %cst_8 = arith.constant dense<0.000000e+00> : vector<8x128xf32>
    %11 = tpu.matmul %9, %10, %cst_8 {dimension_numbers = #tpu.dot_dimension_numbers<[1], [0], [0], [1], [0, 0, 1, 1], [], []>} : vector<8x512xbf16>, vector<512x128xbf16>, vector<8x128xf32> -> vector<8x128xf32>
    %c0_9 = arith.constant 0 : index
    %c0_10 = arith.constant 0 : index
    %12 = vector.load %arg5[%c0_9, %c0_10] : memref<1x128xf32, #tpu.memory_space<vmem>>, vector<1x128xf32>
    %13 = vector.broadcast %12 : vector<1x128xf32> to vector<8x128xf32>
    %14 = arith.addf %11, %13 : vector<8x128xf32>
    %cst_11 = arith.constant dense<0xFF800000> : vector<8xf32>
    %15 = vector.multi_reduction <maximumf>, %14, %cst_11 [1] : vector<8x128xf32> to vector<8xf32>
    %16 = vector.shape_cast %15 : vector<8xf32> to vector<8x1xf32>
    %17 = vector.broadcast %16 : vector<8x1xf32> to vector<8x128xf32>
    %18 = arith.subf %14, %17 : vector<8x128xf32>
    %19 = math.exp %18 : vector<8x128xf32>
    %cst_12 = arith.constant dense<0.000000e+00> : vector<8xf32>
    %20 = vector.multi_reduction <add>, %19, %cst_12 [1] : vector<8x128xf32> to vector<8xf32>
    %21 = vector.shape_cast %20 : vector<8xf32> to vector<8x1xf32>
    %22 = math.log %21 : vector<8x1xf32>
    %23 = vector.broadcast %22 : vector<8x1xf32> to vector<8x128xf32>
    %24 = arith.subf %18, %23 : vector<8x128xf32>
    %25 = arith.truncf %24 : vector<8x128xf32> to vector<8x128xbf16>
    %c0_13 = arith.constant 0 : index
    %c0_14 = arith.constant 0 : index
    %26 = vector.load %arg6[%c0_13, %c0_14] : memref<8x128xbf16, #tpu.memory_space<vmem>>, vector<8x128xbf16>
    tpu.vector_store %arg6[%c0_13, %c0_14], %25 {strides = array<i32>} : memref<8x128xbf16, #tpu.memory_space<vmem>>, vector<8x128xbf16>,
    return
  }
  func.func @transform_0(%arg0: i32) -> (i32, i32) {
    %c0_i32 = arith.constant 0 : i32
    %c0_i32_0 = arith.constant 0 : i32
    return %arg0, %c0_i32 : i32, i32
  }
  func.func @transform_1(%arg0: i32) -> (i32, i32) {
    %c0_i32 = arith.constant 0 : i32
    %c0_i32_0 = arith.constant 0 : i32
    %c0_i32_1 = arith.constant 0 : i32
    return %c0_i32, %c0_i32_0 : i32, i32
  }
  func.func @transform_2(%arg0: i32) -> (i32, i32) {
    %c0_i32 = arith.constant 0 : i32
    %c0_i32_0 = arith.constant 0 : i32
    %c0_i32_1 = arith.constant 0 : i32
    return %c0_i32, %c0_i32_0 : i32, i32
  }
  func.func @transform_3(%arg0: i32) -> (i32, i32) {
    %c0_i32 = arith.constant 0 : i32
    %c0_i32_0 = arith.constant 0 : i32
    %c0_i32_1 = arith.constant 0 : i32
    return %c0_i32, %c0_i32_0 : i32, i32
  }
  func.func @transform_4(%arg0: i32) -> (i32, i32) {
    %c0_i32 = arith.constant 0 : i32
    %c0_i32_0 = arith.constant 0 : i32
    %c0_i32_1 = arith.constant 0 : i32
    return %c0_i32, %c0_i32_0 : i32, i32
  }
  func.func @transform_5(%arg0: i32) -> (i32, i32) {
    %c0_i32 = arith.constant 0 : i32
    %c0_i32_0 = arith.constant 0 : i32
    return %arg0, %c0_i32 : i32, i32
  }
}

module attributes {stable_mosaic.version = 11 : i64} {
  func.func @net_kernel(%arg0: i32, %arg1: memref<8x784xf32, #tpu.memory_space<vmem>>, %arg2: memref<784x512xbf16, #tpu.memory_space<vmem>>, %arg3: memref<1x512xf32, #tpu.memory_space<vmem>>, %arg4: memref<512x128xbf16, #tpu.memory_space<vmem>>, %arg5: memref<1x128xf32, #tpu.memory_space<vmem>>, %arg6: memref<8x128xbf16, #tpu.memory_space<vmem>>) attributes {dimension_semantics = [#tpu.dimension_semantics<parallel>], iteration_bounds = array<i64: 1>, scalar_prefetch = 0 : i64, scratch_operands = 0 : i64, tpu.core_type = #tpu.core_type<tc>, window_params = [{transform_indices = @transform_0, window_bounds = array<i64: 8, 784>}, {pipeline_mode = #tpu.pipeline_mode<synchronous>, transform_indices = @transform_1, window_bounds = array<i64: 784, 512>}, {pipeline_mode = #tpu.pipeline_mode<synchronous>, transform_indices = @transform_2, window_bounds = array<i64: 1, 512>}, {pipeline_mode = #tpu.pipeline_mode<synchronous>, transform_indices = @transform_3, window_bounds = array<i64: 512, 128>}, {pipeline_mode = #tpu.pipeline_mode<synchronous>, transform_indices = @transform_4, window_bounds = array<i64: 1, 128>}, {transform_indices = @transform_5, window_bounds = array<i64: 8, 128>}]} {
    %c0 = arith.constant 0 : index
    %c0_0 = arith.constant 0 : index
    %0 = vector.load %arg1[%c0, %c0_0] : memref<8x784xf32, #tpu.memory_space<vmem>>, vector<8x784xf32>
    %1 = arith.truncf %0 : vector<8x784xf32> to vector<8x784xbf16>
    %c0_1 = arith.constant 0 : index
    %c0_2 = arith.constant 0 : index
    %2 = vector.load %arg2[%c0_1, %c0_2] : memref<784x512xbf16, #tpu.memory_space<vmem>>, vector<784x512xbf16>
    %cst = arith.constant dense<0.000000e+00> : vector<8x512xf32>
    %3 = tpu.matmul %1, %2, %cst {dimension_numbers = #tpu.dot_dimension_numbers<[1], [0], [0], [1], [0, 0, 1, 1], [], []>} : vector<8x784xbf16>, vector<784x512xbf16>, vector<8x512xf32> -> vector<8x512xf32>
    %c0_3 = arith.constant 0 : index
    %c0_4 = arith.constant 0 : index
    %4 = vector.load %arg3[%c0_3, %c0_4] : memref<1x512xf32, #tpu.memory_space<vmem>>, vector<1x512xf32>
    %5 = vector.broadcast %4 : vector<1x512xf32> to vector<8x512xf32>
    %6 = arith.addf %3, %5 : vector<8x512xf32>
    %cst_5 = arith.constant 0.000000e+00 : f32
    %7 = vector.broadcast %cst_5 : f32 to vector<8x512xf32>
    %8 = arith.maximumf %6, %7 : vector<8x512xf32>
    %9 = arith.truncf %8 : vector<8x512xf32> to vector<8x512xbf16>
    %c0_6 = arith.constant 0 : index
    %c0_7 = arith.constant 0 : index
    %10 = vector.load %arg4[%c0_6, %c0_7] : memref<512x128xbf16, #tpu.memory_space<vmem>>, vector<512x128xbf16>
    %cst_8 = arith.constant dense<0.000000e+00> : vector<8x128xf32>
    %11 = tpu.matmul %9, %10, %cst_8 {dimension_numbers = #tpu.dot_dimension_numbers<[1], [0], [0], [1], [0, 0, 1, 1], [], []>} : vector<8x512xbf16>, vector<512x128xbf16>, vector<8x128xf32> -> vector<8x128xf32>
    %c0_9 = arith.constant 0 : index
    %c0_10 = arith.constant 0 : index
    %12 = vector.load %arg5[%c0_9, %c0_10] : memref<1x128xf32, #tpu.memory_space<vmem>>, vector<1x128xf32>
    %13 = vector.broadcast %12 : vector<1x128xf32> to vector<8x128xf32>
    %14 = arith.addf %11, %13 : vector<8x128xf32>
    %cst_11 = arith.constant dense<0xFF800000> : vector<8xf32>
    %15 = vector.multi_reduction <maximumf>, %14, %cst_11 [1] : vector<8x128xf32> to vector<8xf32>
    %16 = vector.shape_cast %15 : vector<8xf32> to vector<8x1xf32>
    %17 = vector.broadcast %16 : vector<8x1xf32> to vector<8x128xf32>
    %18 = arith.subf %14, %17 : vector<8x128xf32>
    %19 = math.exp %18 : vector<8x128xf32>
    %cst_12 = arith.constant dense<0.000000e+00> : vector<8xf32>
    %20 = vector.multi_reduction <add>, %19, %cst_12 [1] : vector<8x128xf32> to vector<8xf32>
    %21 = vector.shape_cast %20 : vector<8xf32> to vector<8x1xf32>
    %22 = math.log %21 : vector<8x1xf32>
    %23 = vector.broadcast %22 : vector<8x1xf32> to vector<8x128xf32>
    %24 = arith.subf %18, %23 : vector<8x128xf32>
    %25 = arith.truncf %24 : vector<8x128xf32> to vector<8x128xbf16>
    %c0_13 = arith.constant 0 : index
    %c0_14 = arith.constant 0 : index
    %26 = vector.load %arg6[%c0_13, %c0_14] : memref<8x128xbf16, #tpu.memory_space<vmem>>, vector<8x128xbf16>
    tpu.vector_store %arg6[%c0_13, %c0_14], %25 {strides = array<i32>} : memref<8x128xbf16, #tpu.memory_space<vmem>>, vector<8x128xbf16>,
    return
  }
  func.func @transform_0(%arg0: i32) -> (i32, i32) {
    %c0_i32 = arith.constant 0 : i32
    %c0_i32_0 = arith.constant 0 : i32
    return %arg0, %c0_i32 : i32, i32
  }
  func.func @transform_1(%arg0: i32) -> (i32, i32) {
    %c0_i32 = arith.constant 0 : i32
    %c0_i32_0 = arith.constant 0 : i32
    %c0_i32_1 = arith.constant 0 : i32
    return %c0_i32, %c0_i32_0 : i32, i32
  }
  func.func @transform_2(%arg0: i32) -> (i32, i32) {
    %c0_i32 = arith.constant 0 : i32
    %c0_i32_0 = arith.constant 0 : i32
    %c0_i32_1 = arith.constant 0 : i32
    return %c0_i32, %c0_i32_0 : i32, i32
  }
  func.func @transform_3(%arg0: i32) -> (i32, i32) {
    %c0_i32 = arith.constant 0 : i32
    %c0_i32_0 = arith.constant 0 : i32
    %c0_i32_1 = arith.constant 0 : i32
    return %c0_i32, %c0_i32_0 : i32, i32
  }
  func.func @transform_4(%arg0: i32) -> (i32, i32) {
    %c0_i32 = arith.constant 0 : i32
    %c0_i32_0 = arith.constant 0 : i32
    %c0_i32_1 = arith.constant 0 : i32
    return %c0_i32, %c0_i32_0 : i32, i32
  }
  func.func @transform_5(%arg0: i32) -> (i32, i32) {
    %c0_i32 = arith.constant 0 : i32
    %c0_i32_0 = arith.constant 0 : i32
    return %arg0, %c0_i32 : i32, i32
  }
}

</mosaic_0001>

<bundles_post_ra>
// kernel: tpu_custom_call.1
= control target key start
LH: loop header
LB: loop body
LE: loop exit
PB: predicated region body
PF: predicated region fallthrough
CT: control target
= control target key end

     0   :  { %10 = vsyncpa [#allocation3], 0  ;;  %s2813_s0 = inlined_call_operand.hbm [shape: f32[8,784], index: 0, kind: input, shape index: {}]   ;;  %s2814_s1 = inlined_call_operand.hbm [shape: bf16[784,512], index: 1, kind: input, shape index: {}]   ;;  %s2815_s2 = inlined_call_operand.vmem [shape: f32[1,512], index: 2, kind: input, shape index: {}]   ;;  %s2816_s3 = inlined_call_operand.hbm [shape: bf16[512,128], index: 3, kind: input, shape index: {}]   ;;  %s2817_s4 = inlined_call_operand.vmem [shape: f32[1,128], index: 4, kind: input, shape index: {}]   ;;  %s2818_s5 = inlined_call_operand.hbm [shape: bf16[8,128], index: 5, kind: output, shape index: {}]  }
   0x1   :  { %11 = vsyncpa [#allocation6], 0 }
   0x2   :  { %12 = vsyncpa [#allocation4], 0  ;;  %s2720_s18 = smov [#allocation5]   ;;  %s2626_s22 = scalar_lea.hbm %s2814_s1, 25088 }
   0x3   :  { %s28_s19 = sshll.u32 %s2720_s18, 4  ;;  %p2627_p0 = scmp.ne.s32.totalorder %s2814_s1, %s2626_s22  ;;  %s29_s19 = int_to_ptr.vmem [resolvable:$true] %s28_s19 }
   0x4   :  { %p2630_p1 = scmp.lt.u32.totalorder %s2626_s22, %s2814_s1 }
   0x6   :  { %p2632_p2 = pnand %p2630_p1, %p2627_p0 }
   0x8   :  { %2635 = shalt.err (!%p2632_p2)
}
   0x9   :  { %s2636_s27 = scalar_lea.vmem %s29_s19, 25088  ;;  %p2641_p4 = scmp.lt.s32.totalorder %s29_s19, %s29_s19 }
   0xa   :  { %p2637_p3 = scmp.ne.s32.totalorder %s29_s19, %s2636_s27  ;;  %p2642_p5 = scmp.lt.s32.totalorder %s2636_s27, %s2636_s27 }
   0xc   :  { %p2643_p6 = por %p2642_p5, %p2641_p4 }
   0xe   :  { %p2644_p7 = pnand %p2643_p6, %p2637_p3 }
  0x10   :  { %2647 = shalt.err (!%p2644_p7)
}
  0x11   :  { %s2721_s28 = smov 256   ;;  %s2722_s29 = smov 16  }
  0x12   :  { %34 = dma.hbm_to_vmem [thread:$0]  %s2814_s1, 25088, %s29_s19, [#allocation6], %s2721_s28, %s2721_s28, %s2722_s29  }
  0x13   :  { %s2723_s7 = smov [#allocation2]   ;;  %s2724_s9 = smov [#allocation7]  }
  0x14   :  { %s19_s8 = sshll.u32 %s2723_s7, 4  ;;  %s42_s10 = sshll.u32 %s2724_s9, 4  ;;  %s20_s8 = int_to_ptr.vmem [resolvable:$true] %s19_s8  ;;  %s43_s10 = int_to_ptr.vmem [resolvable:$true] %s42_s10 }
  0x15   :  { %s2648_s13 = scalar_lea.hbm %s2813_s0, 896 }
  0x16   :  { %p2649_p8 = scmp.ne.s32.totalorder %s2813_s0, %s2648_s13  ;;  %p2652_p9 = scmp.lt.u32.totalorder %s2648_s13, %s2813_s0 }
  0x18   :  { %p2654_p10 = pnand %p2652_p9, %p2649_p8 }
  0x1a   :  { %2657 = shalt.err (!%p2654_p10)
}
  0x1b   :  { %s2658_s1 = scalar_lea.vmem %s20_s8, 896  ;;  %p2663_p12 = scmp.lt.s32.totalorder %s20_s8, %s20_s8 }
  0x1c   :  { %p2659_p11 = scmp.ne.s32.totalorder %s20_s8, %s2658_s1  ;;  %p2664_p13 = scmp.lt.s32.totalorder %s2658_s1, %s2658_s1 }
  0x1e   :  { %p2665_p0 = por %p2664_p13, %p2663_p12 }
  0x20   :  { %p2666_p1 = pnand %p2665_p0, %p2659_p11 }
  0x22   :  { %2669 = shalt.err (!%p2666_p1)
}
  0x23   :  { %22 = dma.hbm_to_vmem [thread:$0]  %s2813_s0, 896, %s20_s8, [#allocation3]  }
  0x24   :  { %s2670_s22 = scalar_lea.hbm %s2816_s3, 4096 }
  0x25   :  { %p2671_p2 = scmp.ne.s32.totalorder %s2816_s3, %s2670_s22  ;;  %p2674_p3 = scmp.lt.u32.totalorder %s2670_s22, %s2816_s3 }
  0x27   :  { %p2676_p4 = pnand %p2674_p3, %p2671_p2 }
  0x29   :  { %2679 = shalt.err (!%p2676_p4)
}
  0x2a   :  { %s2680_s27 = scalar_lea.vmem %s43_s10, 4096  ;;  %p2685_p6 = scmp.lt.s32.totalorder %s43_s10, %s43_s10 }
  0x2b   :  { %p2681_p5 = scmp.ne.s32.totalorder %s43_s10, %s2680_s27  ;;  %p2686_p7 = scmp.lt.s32.totalorder %s2680_s27, %s2680_s27 }
  0x2d   :  { %p2687_p8 = por %p2686_p7, %p2685_p6 }
  0x2f   :  { %p2688_p9 = pnand %p2687_p8, %p2681_p5 }
  0x31   :  { %2691 = shalt.err (!%p2688_p9)
}
  0x32   :  { %s2725_s0 = smov 64   ;;  %s2726_s28 = smov 4  }
  0x33   :  { %48 = dma.hbm_to_vmem [thread:$0]  %s2816_s3, 4096, %s43_s10, [#allocation6], %s2725_s0, %s2725_s0, %s2726_s28  }
  0x34   :  { %2714 = dma.done.wait [#allocation3], 896  }
  0x35   :  { %2715 = vsyncadd [#allocation3], 4294966400 }
  0x36   :  { %2716 = dma.done.wait [#allocation6], 29184  }
  0x37   :  { %2717 = vsyncadd [#allocation6], 4294938112  ;;  %v2296_v0 = vld [vmem:[#allocation5 + $0x4] ss:$16 sps:$4 sm:$0xff]   ;;  %v2298_v1 = vld [vmem:[#allocation5 + $0xc] ss:$16 sps:$4 sm:$0xff]  }
  0x38   :  { %1277 = vmatprep.subr.bf16.mxu0 %v2296_v0  ;;  %v2300_v2 = vld [vmem:[#allocation5] ss:$16 sps:$4 sm:$0xff]   ;;  %v2301_v3 = vld [vmem:[#allocation5 + $0x8] ss:$16 sps:$4 sm:$0xff]   ;;  %1441 = vmatprep.subr.bf16.mxu1 %v2298_v1  ;;  %v2302_v4 = vld [vmem:[#allocation5 + $0x24] ss:$16 sps:$4 sm:$0xff]  }
  0x39   :  { %1278 = vmatpush1.bf16.msra.mxu0 %v2300_v2  ;;  %1442 = vmatpush1.bf16.msra.mxu1 %v2301_v3  ;;  %v2304_v5 = vld [vmem:[#allocation5 + $0x2c] ss:$16 sps:$4 sm:$0xff]   ;;  %v2306_v6 = vld [vmem:[#allocation5 + $0x20] ss:$16 sps:$4 sm:$0xff]   ;;  %v2307_v7 = vld [vmem:[#allocation5 + $0x28] ss:$16 sps:$4 sm:$0xff]  }
  0x3a   :  { %1279 = vmatprep.subr.bf16.mxu0 %v2302_v4  ;;  %1443 = vmatprep.subr.bf16.mxu1 %v2304_v5  ;;  %v2308_v8 = vld [vmem:[#allocation5 + $0x44] ss:$16 sps:$4 sm:$0xff]   ;;  %v2310_v9 = vld [vmem:[#allocation5 + $0x4c] ss:$16 sps:$4 sm:$0xff]   ;;  %v2312_v10 = vld [vmem:[#allocation5 + $0x40] ss:$16 sps:$4 sm:$0xff]  }
  0x3b   :  { %v2313_v11 = vld [vmem:[#allocation5 + $0x48] ss:$16 sps:$4 sm:$0xff]   ;;  %v2314_v12 = vld [vmem:[#allocation5 + $0x64] ss:$16 sps:$4 sm:$0xff]   ;;  %v2316_v13 = vld [vmem:[#allocation5 + $0x6c] ss:$16 sps:$4 sm:$0xff]  }
  0x3c   :  { %v2318_v14 = vld [vmem:[#allocation5 + $0x60] ss:$16 sps:$4 sm:$0xff]   ;;  %v2319_v15 = vld [vmem:[#allocation5 + $0x68] ss:$16 sps:$4 sm:$0xff]   ;;  %v2320_v16 = vld [vmem:[#allocation5 + $0x84] ss:$16 sps:$4 sm:$0xff]  }
  0x3d   :  { %1280 = vmatpush1.bf16.msra.mxu0 %v2306_v6  ;;  %1444 = vmatpush1.bf16.msra.mxu1 %v2307_v7  ;;  %v2322_v17 = vld [vmem:[#allocation5 + $0x8c] ss:$16 sps:$4 sm:$0xff]   ;;  %v2324_v18 = vld [vmem:[#allocation5 + $0x80] ss:$16 sps:$4 sm:$0xff]   ;;  %v2325_v19 = vld [vmem:[#allocation5 + $0x88] ss:$16 sps:$4 sm:$0xff]  }
  0x3e   :  { %1281 = vmatprep.subr.bf16.mxu0 %v2308_v8  ;;  %1445 = vmatprep.subr.bf16.mxu1 %v2310_v9  ;;  %v2326_v20 = vld [vmem:[#allocation5 + $0xa4] ss:$16 sps:$4 sm:$0xff]   ;;  %v2328_v21 = vld [vmem:[#allocation5 + $0xac] ss:$16 sps:$4 sm:$0xff]   ;;  %v2330_v22 = vld [vmem:[#allocation5 + $0xa0] ss:$16 sps:$4 sm:$0xff]  }
  0x3f   :  { %v2331_v23 = vld [vmem:[#allocation5 + $0xa8] ss:$16 sps:$4 sm:$0xff]   ;;  %v2332_v24 = vld [vmem:[#allocation5 + $0xc4] ss:$16 sps:$4 sm:$0xff]   ;;  %v2334_v25 = vld [vmem:[#allocation5 + $0xcc] ss:$16 sps:$4 sm:$0xff]  }
  0x40   :  { %v2336_v26 = vld [vmem:[#allocation5 + $0xc0] ss:$16 sps:$4 sm:$0xff]   ;;  %v2337_v27 = vld [vmem:[#allocation5 + $0xc8] ss:$16 sps:$4 sm:$0xff]   ;;  %v2338_v28 = vld [vmem:[#allocation5 + $0xe4] ss:$16 sps:$4 sm:$0xff]  }
  0x41   :  { %1282 = vmatpush1.bf16.msra.mxu0 %v2312_v10  ;;  %1446 = vmatpush1.bf16.msra.mxu1 %v2313_v11  ;;  %v2340_v29 = vld [vmem:[#allocation5 + $0xec] ss:$16 sps:$4 sm:$0xff]   ;;  %v2342_v30 = vld [vmem:[#allocation5 + $0xe0] ss:$16 sps:$4 sm:$0xff]   ;;  %v2343_v31 = vld [vmem:[#allocation5 + $0xe8] ss:$16 sps:$4 sm:$0xff]  }
  0x42   :  { %1283 = vmatprep.subr.bf16.mxu0 %v2314_v12  ;;  %1447 = vmatprep.subr.bf16.mxu1 %v2316_v13  ;;  %v2344_v32 = vld [vmem:[#allocation5 + $0x104] ss:$16 sps:$4 sm:$0xff]   ;;  %v2346_v33 = vld [vmem:[#allocation5 + $0x10c] ss:$16 sps:$4 sm:$0xff]   ;;  %v2348_v34 = vld [vmem:[#allocation5 + $0x100] ss:$16 sps:$4 sm:$0xff]  }
  0x43   :  { %v2349_v35 = vld [vmem:[#allocation5 + $0x108] ss:$16 sps:$4 sm:$0xff]   ;;  %v2350_v36 = vld [vmem:[#allocation5 + $0x124] ss:$16 sps:$4 sm:$0xff]   ;;  %v2352_v37 = vld [vmem:[#allocation5 + $0x12c] ss:$16 sps:$4 sm:$0xff]  }
  0x44   :  { %v2354_v38 = vld [vmem:[#allocation5 + $0x120] ss:$16 sps:$4 sm:$0xff]   ;;  %v2355_v39 = vld [vmem:[#allocation5 + $0x128] ss:$16 sps:$4 sm:$0xff]   ;;  %v2356_v40 = vld [vmem:[#allocation5 + $0x144] ss:$16 sps:$4 sm:$0xff]  }
  0x45   :  { %1284 = vmatpush1.bf16.msra.mxu0 %v2318_v14  ;;  %1448 = vmatpush1.bf16.msra.mxu1 %v2319_v15  ;;  %v2358_v41 = vld [vmem:[#allocation5 + $0x14c] ss:$16 sps:$4 sm:$0xff]   ;;  %v2360_v42 = vld [vmem:[#allocation5 + $0x140] ss:$16 sps:$4 sm:$0xff]   ;;  %v2361_v43 = vld [vmem:[#allocation5 + $0x148] ss:$16 sps:$4 sm:$0xff]  }
  0x46   :  { %1285 = vmatprep.subr.bf16.mxu0 %v2320_v16  ;;  %1449 = vmatprep.subr.bf16.mxu1 %v2322_v17  ;;  %v2362_v44 = vld [vmem:[#allocation5 + $0x164] ss:$16 sps:$4 sm:$0xff]   ;;  %v2364_v45 = vld [vmem:[#allocation5 + $0x16c] ss:$16 sps:$4 sm:$0xff]   ;;  %v2366_v47 = vld [vmem:[#allocation5 + $0x160] ss:$16 sps:$4 sm:$0xff]  }
  0x47   :  { %v62_v46 = vld [vmem:[#allocation2 + $0x8] sm:$0xff]  ;;  %v2367_v49 = vld [vmem:[#allocation5 + $0x168] ss:$16 sps:$4 sm:$0xff]   ;;  %v2370_v51 = vld [vmem:[#allocation5 + $0x18c] ss:$16 sps:$4 sm:$0xff]   ;;  %vm1273_vm0 = vcmask 130048  }
  0x48   :  { %v69_v48 = vpack.c.bf16 %v62_v46, %v62_v46  ;;  %v2368_v50 = vld [vmem:[#allocation5 + $0x184] ss:$16 sps:$4 sm:$0xff]   ;;  %v2372_v52 = vld [vmem:[#allocation5 + $0x180] ss:$16 sps:$4 sm:$0xff]   ;;  %v2373_v53 = vld [vmem:[#allocation5 + $0x188] ss:$16 sps:$4 sm:$0xff]  }
  0x49   :  { %1286 = vmatpush1.bf16.msra.mxu0 %v2324_v18  ;;  %1450 = vmatpush1.bf16.msra.mxu1 %v2325_v19  ;;  %v2374_v54 = vld [vmem:[#allocation5 + $0x1a4] ss:$16 sps:$4 sm:$0xff]   ;;  %v2376_v55 = vld [vmem:[#allocation5 + $0x1ac] ss:$16 sps:$4 sm:$0xff]   ;;  %v2378_v56 = vld [vmem:[#allocation5 + $0x1a0] ss:$16 sps:$4 sm:$0xff]  }
  0x4a   :  { %1287 = vmatprep.subr.bf16.mxu0 %v2326_v20  ;;  %1451 = vmatprep.subr.bf16.mxu1 %v2328_v21  ;;  %v2379_v57 = vld [vmem:[#allocation5 + $0x1a8] ss:$16 sps:$4 sm:$0xff]   ;;  %v2380_v58 = vld [vmem:[#allocation5 + $0x1c4] ss:$16 sps:$4 sm:$0xff]   ;;  %v2382_v59 = vld [vmem:[#allocation5 + $0x1cc] ss:$16 sps:$4 sm:$0xff]  }
  0x4b   :  { %1309 = vmatprep.mubr.bf16.mxu0 %v69_v48  ;;  %1473 = vmatprep.mubr.bf16.mxu1 %v69_v48  ;;  %v2384_v60 = vld [vmem:[#allocation5 + $0x1c0] ss:$16 sps:$4 sm:$0xff]   ;;  %v2385_v61 = vld [vmem:[#allocation5 + $0x1c8] ss:$16 sps:$4 sm:$0xff]   ;;  %v2386_v62 = vld [vmem:[#allocation5 + $0x1e4] ss:$16 sps:$4 sm:$0xff]  }
  0x4c   :  { %v2388_v63 = vld [vmem:[#allocation5 + $0x1ec] ss:$16 sps:$4 sm:$0xff]   ;;  %v2390_v0 = vld [vmem:[#allocation5 + $0x1e0] ss:$16 sps:$4 sm:$0xff]   ;;  %v2391_v1 = vld [vmem:[#allocation5 + $0x1e8] ss:$16 sps:$4 sm:$0xff]  }
  0x4d   :  { %1288 = vmatpush1.bf16.msra.mxu0 %v2330_v22  ;;  %1452 = vmatpush1.bf16.msra.mxu1 %v2331_v23  ;;  %v61_v2 = vld [vmem:[#allocation2] sm:$0xff]  ;;  %v2394_v3 = vld [vmem:[#allocation5 + $0x204] ss:$16 sps:$4 sm:$0xff]   ;;  %v2392_v6 = vld [vmem:[#allocation5 + $0x200] ss:$16 sps:$4 sm:$0xff]  }
  0x4e   :  { %1289 = vmatprep.subr.bf16.mxu0 %v2332_v24  ;;  %1453 = vmatprep.subr.bf16.mxu1 %v2334_v25  ;;  %v2397_v4 = vld [vmem:[#allocation5 + $0x20c] ss:$16 sps:$4 sm:$0xff]   ;;  %v68_v5 = vpack.c.bf16 %v61_v2, %v61_v2  ;;  %v2395_v7 = vld [vmem:[#allocation5 + $0x208] ss:$16 sps:$4 sm:$0xff]   ;;  %v2400_v8 = vld [vmem:[#allocation5 + $0x224] ss:$16 sps:$4 sm:$0xff]  }
  0x4f   :  { %v2403_v9 = vld [vmem:[#allocation5 + $0x22c] ss:$16 sps:$4 sm:$0xff]   ;;  %v2398_v10 = vld [vmem:[#allocation5 + $0x220] ss:$16 sps:$4 sm:$0xff]   ;;  %v2401_v11 = vld [vmem:[#allocation5 + $0x228] ss:$16 sps:$4 sm:$0xff]  }
  0x50   :  { %v2406_v12 = vld [vmem:[#allocation5 + $0x244] ss:$16 sps:$4 sm:$0xff]   ;;  %v2409_v13 = vld [vmem:[#allocation5 + $0x24c] ss:$16 sps:$4 sm:$0xff]   ;;  %v2404_v14 = vld [vmem:[#allocation5 + $0x240] ss:$16 sps:$4 sm:$0xff]  }
  0x51   :  { %1290 = vmatpush1.bf16.msra.mxu0 %v2336_v26  ;;  %1454 = vmatpush1.bf16.msra.mxu1 %v2337_v27  ;;  %v2407_v15 = vld [vmem:[#allocation5 + $0x248] ss:$16 sps:$4 sm:$0xff]   ;;  %v2412_v16 = vld [vmem:[#allocation5 + $0x264] ss:$16 sps:$4 sm:$0xff]   ;;  %v2415_v17 = vld [vmem:[#allocation5 + $0x26c] ss:$16 sps:$4 sm:$0xff]  }
  0x52   :  { %1291 = vmatprep.subr.bf16.mxu0 %v2338_v28  ;;  %1455 = vmatprep.subr.bf16.mxu1 %v2340_v29  ;;  %v2410_v18 = vld [vmem:[#allocation5 + $0x260] ss:$16 sps:$4 sm:$0xff]   ;;  %v2413_v19 = vld [vmem:[#allocation5 + $0x268] ss:$16 sps:$4 sm:$0xff]   ;;  %v2418_v20 = vld [vmem:[#allocation5 + $0x284] ss:$16 sps:$4 sm:$0xff]  }
  0x53   :  { %v2421_v21 = vld [vmem:[#allocation5 + $0x28c] ss:$16 sps:$4 sm:$0xff]   ;;  %v2416_v22 = vld [vmem:[#allocation5 + $0x280] ss:$16 sps:$4 sm:$0xff]   ;;  %v2419_v23 = vld [vmem:[#allocation5 + $0x288] ss:$16 sps:$4 sm:$0xff]  }
  0x54   :  { %v2424_v24 = vld [vmem:[#allocation5 + $0x2a4] ss:$16 sps:$4 sm:$0xff]   ;;  %v2427_v25 = vld [vmem:[#allocation5 + $0x2ac] ss:$16 sps:$4 sm:$0xff]   ;;  %v2422_v26 = vld [vmem:[#allocation5 + $0x2a0] ss:$16 sps:$4 sm:$0xff]  }
  0x55   :  { %1292 = vmatpush1.bf16.msra.mxu0 %v2342_v30  ;;  %1456 = vmatpush1.bf16.msra.mxu1 %v2343_v31  ;;  %v2425_v27 = vld [vmem:[#allocation5 + $0x2a8] ss:$16 sps:$4 sm:$0xff]   ;;  %v2430_v28 = vld [vmem:[#allocation5 + $0x2c4] ss:$16 sps:$4 sm:$0xff]   ;;  %v2433_v29 = vld [vmem:[#allocation5 + $0x2cc] ss:$16 sps:$4 sm:$0xff]  }
  0x56   :  { %1293 = vmatprep.subr.bf16.mxu0 %v2344_v32  ;;  %1457 = vmatprep.subr.bf16.mxu1 %v2346_v33  ;;  %v64_v30 = vld [vmem:[#allocation2 + $0x18] sm:$0xff]  ;;  %v2431_v33 = vld [vmem:[#allocation5 + $0x2c8] ss:$16 sps:$4 sm:$0xff]  }
  0x57   :  { %v2428_v31 = vld [vmem:[#allocation5 + $0x2c0] ss:$16 sps:$4 sm:$0xff]   ;;  %v71_v32 = vpack.c.bf16 %v64_v30, %v64_v30  ;;  %v2454_v46 = vld [vmem:[#allocation5 + $0x344] ss:$16 sps:$4 sm:$0xff]  }
  0x58   :  { %v2452_v48 = vld [vmem:[#allocation5 + $0x340] ss:$16 sps:$4 sm:$0xff]   ;;  %v2484_v2 = vld [vmem:[#allocation5 + $0x3e4] ss:$16 sps:$4 sm:$0xff]  }
  0x59   :  { %1294 = vmatpush1.bf16.msra.mxu0 %v2348_v34  ;;  %1458 = vmatpush1.bf16.msra.mxu1 %v2349_v35  ;;  %v2436_v34 = vld [vmem:[#allocation5 + $0x2e4] ss:$16 sps:$4 sm:$0xff]   ;;  %v2439_v35 = vld [vmem:[#allocation5 + $0x2ec] ss:$16 sps:$4 sm:$0xff]  }
  0x5a   :  { %1295 = vmatprep.subr.bf16.mxu0 %v2350_v36  ;;  %1459 = vmatprep.subr.bf16.mxu1 %v2352_v37  ;;  %v2434_v36 = vld [vmem:[#allocation5 + $0x2e0] ss:$16 sps:$4 sm:$0xff]   ;;  %v2437_v37 = vld [vmem:[#allocation5 + $0x2e8] ss:$16 sps:$4 sm:$0xff]   ;;  %v2520_v30 = vld [vmem:[#allocation5 + $0x4a4] ss:$16 sps:$4 sm:$0xff]  }
  0x5d   :  { %1296 = vmatpush1.bf16.msra.mxu0 %v2354_v38  ;;  %1460 = vmatpush1.bf16.msra.mxu1 %v2355_v39  ;;  %v2442_v38 = vld [vmem:[#allocation5 + $0x304] ss:$16 sps:$4 sm:$0xff]   ;;  %v2445_v39 = vld [vmem:[#allocation5 + $0x30c] ss:$16 sps:$4 sm:$0xff]  }
  0x5e   :  { %1297 = vmatprep.subr.bf16.mxu0 %v2356_v40  ;;  %1461 = vmatprep.subr.bf16.mxu1 %v2358_v41  ;;  %v2440_v40 = vld [vmem:[#allocation5 + $0x300] ss:$16 sps:$4 sm:$0xff]   ;;  %v2443_v41 = vld [vmem:[#allocation5 + $0x308] ss:$16 sps:$4 sm:$0xff]  }
  0x61   :  { %1298 = vmatpush1.bf16.msra.mxu0 %v2360_v42  ;;  %1462 = vmatpush1.bf16.msra.mxu1 %v2361_v43  ;;  %v2448_v42 = vld [vmem:[#allocation5 + $0x324] ss:$16 sps:$4 sm:$0xff]   ;;  %v2451_v43 = vld [vmem:[#allocation5 + $0x32c] ss:$16 sps:$4 sm:$0xff]  }
  0x62   :  { %1299 = vmatprep.subr.bf16.mxu0 %v2362_v44  ;;  %1463 = vmatprep.subr.bf16.mxu1 %v2364_v45  ;;  %v2446_v44 = vld [vmem:[#allocation5 + $0x320] ss:$16 sps:$4 sm:$0xff]   ;;  %v2449_v45 = vld [vmem:[#allocation5 + $0x328] ss:$16 sps:$4 sm:$0xff]  }
  0x65   :  { %1300 = vmatpush1.bf16.msra.mxu0 %v2366_v47  ;;  %1464 = vmatpush1.bf16.msra.mxu1 %v2367_v49  ;;  %v2457_v47 = vld [vmem:[#allocation5 + $0x34c] ss:$16 sps:$4 sm:$0xff]   ;;  %v2455_v49 = vld [vmem:[#allocation5 + $0x348] ss:$16 sps:$4 sm:$0xff]  }
  0x66   :  { %1301 = vmatprep.subr.bf16.mxu0 %v2368_v50  ;;  %1465 = vmatprep.subr.bf16.mxu1 %v2370_v51  ;;  %v2460_v50 = vld [vmem:[#allocation5 + $0x364] ss:$16 sps:$4 sm:$0xff]   ;;  %v2463_v51 = vld [vmem:[#allocation5 + $0x36c] ss:$16 sps:$4 sm:$0xff]  }
  0x69   :  { %1302 = vmatpush1.bf16.msra.mxu0 %v2372_v52  ;;  %1466 = vmatpush1.bf16.msra.mxu1 %v2373_v53  ;;  %v2458_v52 = vld [vmem:[#allocation5 + $0x360] ss:$16 sps:$4 sm:$0xff]   ;;  %v2461_v53 = vld [vmem:[#allocation5 + $0x368] ss:$16 sps:$4 sm:$0xff]  }
  0x6a   :  { %1303 = vmatprep.subr.bf16.mxu0 %v2374_v54  ;;  %1467 = vmatprep.subr.bf16.mxu1 %v2376_v55  ;;  %v2466_v54 = vld [vmem:[#allocation5 + $0x384] ss:$16 sps:$4 sm:$0xff]   ;;  %v2469_v55 = vld [vmem:[#allocation5 + $0x38c] ss:$16 sps:$4 sm:$0xff]  }
  0x6d   :  { %1304 = vmatpush1.bf16.msra.mxu0 %v2378_v56  ;;  %1468 = vmatpush1.bf16.msra.mxu1 %v2379_v57  ;;  %v2464_v56 = vld [vmem:[#allocation5 + $0x380] ss:$16 sps:$4 sm:$0xff]   ;;  %v2467_v57 = vld [vmem:[#allocation5 + $0x388] ss:$16 sps:$4 sm:$0xff]  }
  0x6e   :  { %1305 = vmatprep.subr.bf16.mxu0 %v2380_v58  ;;  %1469 = vmatprep.subr.bf16.mxu1 %v2382_v59  ;;  %v2472_v58 = vld [vmem:[#allocation5 + $0x3a4] ss:$16 sps:$4 sm:$0xff]   ;;  %v2475_v59 = vld [vmem:[#allocation5 + $0x3ac] ss:$16 sps:$4 sm:$0xff]  }
  0x71   :  { %1306 = vmatpush1.bf16.msra.mxu0 %v2384_v60  ;;  %1470 = vmatpush1.bf16.msra.mxu1 %v2385_v61  ;;  %v2470_v60 = vld [vmem:[#allocation5 + $0x3a0] ss:$16 sps:$4 sm:$0xff]   ;;  %v2473_v61 = vld [vmem:[#allocation5 + $0x3a8] ss:$16 sps:$4 sm:$0xff]  }
  0x72   :  { %1307 = vmatprep.subr.bf16.mxu0 %v2386_v62  ;;  %1471 = vmatprep.subr.bf16.mxu1 %v2388_v63  ;;  %v2478_v62 = vld [vmem:[#allocation5 + $0x3c4] ss:$16 sps:$4 sm:$0xff]   ;;  %v2481_v63 = vld [vmem:[#allocation5 + $0x3cc] ss:$16 sps:$4 sm:$0xff]  }
  0x75   :  { %1308 = vmatpush1.bf16.msra.mxu0 %v2390_v0  ;;  %1472 = vmatpush1.bf16.msra.mxu1 %v2391_v1  ;;  %v2476_v0 = vld [vmem:[#allocation5 + $0x3c0] ss:$16 sps:$4 sm:$0xff]   ;;  %v2479_v1 = vld [vmem:[#allocation5 + $0x3c8] ss:$16 sps:$4 sm:$0xff]  }
  0x76   :  { %1318 = vmatprep.subr.bf16.mxu0 %v2394_v3  ;;  %1482 = vmatprep.subr.bf16.mxu1 %v2397_v4  ;;  %v2487_v3 = vld [vmem:[#allocation5 + $0x3ec] ss:$16 sps:$4 sm:$0xff]   ;;  %v2482_v4 = vld [vmem:[#allocation5 + $0x3e0] ss:$16 sps:$4 sm:$0xff]  }
  0x78   :  { %1310 = vmatmul.mubr.bf16.vlgmr.msra.gmra.mrb[0].mxu0 %v68_v5  ;;  %1474 = vmatmul.mubr.bf16.vlgmr.msra.gmra.mrb[0].mxu1 %v68_v5  ;;  %v2485_v5 = vld [vmem:[#allocation5 + $0x3e8] ss:$16 sps:$4 sm:$0xff]  }
  0x79   :  { %1319 = vmatpush1.bf16.msra.mxu0 %v2392_v6  ;;  %1483 = vmatpush1.bf16.msra.mxu1 %v2395_v7  ;;  %v2490_v6 = vld [vmem:[#allocation5 + $0x404] ss:$16 sps:$4 sm:$0xff]   ;;  %v63_v7 = vld [vmem:[#allocation2 + $0x10] sm:$0xff] }
  0x7a   :  { %1320 = vmatprep.subr.bf16.mxu0 %v2400_v8  ;;  %1484 = vmatprep.subr.bf16.mxu1 %v2403_v9  ;;  %v2493_v8 = vld [vmem:[#allocation5 + $0x40c] ss:$16 sps:$4 sm:$0xff]   ;;  %v2488_v9 = vld [vmem:[#allocation5 + $0x400] ss:$16 sps:$4 sm:$0xff]  }
  0x7b   :  { %1350 = vmatprep.mubr.bf16.mxu0 %v71_v32  ;;  %1514 = vmatprep.mubr.bf16.mxu1 %v71_v32  ;;  %v2518_v32 = vld [vmem:[#allocation5 + $0x4a0] ss:$16 sps:$4 sm:$0xff]  }
  0x7d   :  { %1321 = vmatpush1.bf16.msra.mxu0 %v2398_v10  ;;  %1485 = vmatpush1.bf16.msra.mxu1 %v2401_v11  ;;  %v70_v10 = vpack.c.bf16 %v63_v7, %v63_v7  ;;  %v2491_v11 = vld [vmem:[#allocation5 + $0x408] ss:$16 sps:$4 sm:$0xff]   ;;  %v2583_v7 = vld [vmem:[#allocation5 + $0x5ec] ss:$16 sps:$4 sm:$0xff]  }
  0x7e   :  { %1322 = vmatprep.subr.bf16.mxu0 %v2406_v12  ;;  %1486 = vmatprep.subr.bf16.mxu1 %v2409_v13  ;;  %v2496_v12 = vld [vmem:[#allocation5 + $0x424] ss:$16 sps:$4 sm:$0xff]   ;;  %v2499_v13 = vld [vmem:[#allocation5 + $0x42c] ss:$16 sps:$4 sm:$0xff]  }
  0x81   :  { %1323 = vmatpush1.bf16.msra.mxu0 %v2404_v14  ;;  %1487 = vmatpush1.bf16.msra.mxu1 %v2407_v15  ;;  %v66_v14 = vld [vmem:[#allocation2 + $0x28] sm:$0xff] }
  0x82   :  { %1324 = vmatprep.subr.bf16.mxu0 %v2412_v16  ;;  %1488 = vmatprep.subr.bf16.mxu1 %v2415_v17  ;;  %v73_v15 = vpack.c.bf16 %v66_v14, %v66_v14  ;;  %v2494_v16 = vld [vmem:[#allocation5 + $0x420] ss:$16 sps:$4 sm:$0xff]   ;;  %v2497_v17 = vld [vmem:[#allocation5 + $0x428] ss:$16 sps:$4 sm:$0xff]  }
  0x83   :  { %v2584_v14 = vld [vmem:[#allocation5 + $0x600] ss:$16 sps:$4 sm:$0xff]  }
  0x85   :  { %1325 = vmatpush1.bf16.msra.mxu0 %v2410_v18  ;;  %1489 = vmatpush1.bf16.msra.mxu1 %v2413_v19  ;;  %v2502_v18 = vld [vmem:[#allocation5 + $0x444] ss:$16 sps:$4 sm:$0xff]   ;;  %v2505_v19 = vld [vmem:[#allocation5 + $0x44c] ss:$16 sps:$4 sm:$0xff]  }
  0x86   :  { %1326 = vmatprep.subr.bf16.mxu0 %v2418_v20  ;;  %1490 = vmatprep.subr.bf16.mxu1 %v2421_v21  ;;  %v2500_v20 = vld [vmem:[#allocation5 + $0x440] ss:$16 sps:$4 sm:$0xff]   ;;  %v2503_v21 = vld [vmem:[#allocation5 + $0x448] ss:$16 sps:$4 sm:$0xff]  }
  0x89   :  { %1327 = vmatpush1.bf16.msra.mxu0 %v2416_v22  ;;  %1491 = vmatpush1.bf16.msra.mxu1 %v2419_v23  ;;  %v2508_v22 = vld [vmem:[#allocation5 + $0x464] ss:$16 sps:$4 sm:$0xff]   ;;  %v2511_v23 = vld [vmem:[#allocation5 + $0x46c] ss:$16 sps:$4 sm:$0xff]  }
  0x8a   :  { %1328 = vmatprep.subr.bf16.mxu0 %v2424_v24  ;;  %1492 = vmatprep.subr.bf16.mxu1 %v2427_v25  ;;  %v2506_v24 = vld [vmem:[#allocation5 + $0x460] ss:$16 sps:$4 sm:$0xff]   ;;  %v2509_v25 = vld [vmem:[#allocation5 + $0x468] ss:$16 sps:$4 sm:$0xff]  }
  0x8d   :  { %1329 = vmatpush1.bf16.msra.mxu0 %v2422_v26  ;;  %1493 = vmatpush1.bf16.msra.mxu1 %v2425_v27  ;;  %v2514_v26 = vld [vmem:[#allocation5 + $0x484] ss:$16 sps:$4 sm:$0xff]   ;;  %v2517_v27 = vld [vmem:[#allocation5 + $0x48c] ss:$16 sps:$4 sm:$0xff]  }
  0x8e   :  { %1330 = vmatprep.subr.bf16.mxu0 %v2430_v28  ;;  %1494 = vmatprep.subr.bf16.mxu1 %v2433_v29  ;;  %v2512_v28 = vld [vmem:[#allocation5 + $0x480] ss:$16 sps:$4 sm:$0xff]   ;;  %v2515_v29 = vld [vmem:[#allocation5 + $0x488] ss:$16 sps:$4 sm:$0xff]  }
  0x91   :  { %1331 = vmatpush1.bf16.msra.mxu0 %v2428_v31  ;;  %1495 = vmatpush1.bf16.msra.mxu1 %v2431_v33  ;;  %v2523_v31 = vld [vmem:[#allocation5 + $0x4ac] ss:$16 sps:$4 sm:$0xff]   ;;  %v2521_v33 = vld [vmem:[#allocation5 + $0x4a8] ss:$16 sps:$4 sm:$0xff]  }
  0x92   :  { %1332 = vmatprep.subr.bf16.mxu0 %v2436_v34  ;;  %1496 = vmatprep.subr.bf16.mxu1 %v2439_v35  ;;  %v2526_v34 = vld [vmem:[#allocation5 + $0x4c4] ss:$16 sps:$4 sm:$0xff]   ;;  %v2529_v35 = vld [vmem:[#allocation5 + $0x4cc] ss:$16 sps:$4 sm:$0xff]  }
  0x95   :  { %1333 = vmatpush1.bf16.msra.mxu0 %v2434_v36  ;;  %1497 = vmatpush1.bf16.msra.mxu1 %v2437_v37  ;;  %v2524_v36 = vld [vmem:[#allocation5 + $0x4c0] ss:$16 sps:$4 sm:$0xff]   ;;  %v2527_v37 = vld [vmem:[#allocation5 + $0x4c8] ss:$16 sps:$4 sm:$0xff]  }
  0x96   :  { %1334 = vmatprep.subr.bf16.mxu0 %v2442_v38  ;;  %1498 = vmatprep.subr.bf16.mxu1 %v2445_v39  ;;  %v2532_v38 = vld [vmem:[#allocation5 + $0x4e4] ss:$16 sps:$4 sm:$0xff]   ;;  %v2535_v39 = vld [vmem:[#allocation5 + $0x4ec] ss:$16 sps:$4 sm:$0xff]  }
  0x99   :  { %1335 = vmatpush1.bf16.msra.mxu0 %v2440_v40  ;;  %1499 = vmatpush1.bf16.msra.mxu1 %v2443_v41  ;;  %v2530_v40 = vld [vmem:[#allocation5 + $0x4e0] ss:$16 sps:$4 sm:$0xff]   ;;  %v2533_v41 = vld [vmem:[#allocation5 + $0x4e8] ss:$16 sps:$4 sm:$0xff]  }
  0x9a   :  { %1336 = vmatprep.subr.bf16.mxu0 %v2448_v42  ;;  %1500 = vmatprep.subr.bf16.mxu1 %v2451_v43  ;;  %v2538_v42 = vld [vmem:[#allocation5 + $0x504] ss:$16 sps:$4 sm:$0xff]   ;;  %v2541_v43 = vld [vmem:[#allocation5 + $0x50c] ss:$16 sps:$4 sm:$0xff]  }
  0x9d   :  { %1337 = vmatpush1.bf16.msra.mxu0 %v2446_v44  ;;  %1501 = vmatpush1.bf16.msra.mxu1 %v2449_v45  ;;  %v2536_v44 = vld [vmem:[#allocation5 + $0x500] ss:$16 sps:$4 sm:$0xff]   ;;  %v2539_v45 = vld [vmem:[#allocation5 + $0x508] ss:$16 sps:$4 sm:$0xff]  }
  0x9e   :  { %1338 = vmatprep.subr.bf16.mxu0 %v2454_v46  ;;  %1502 = vmatprep.subr.bf16.mxu1 %v2457_v47  ;;  %v2544_v46 = vld [vmem:[#allocation5 + $0x524] ss:$16 sps:$4 sm:$0xff]   ;;  %v2547_v47 = vld [vmem:[#allocation5 + $0x52c] ss:$16 sps:$4 sm:$0xff]  }
  0xa1   :  { %1339 = vmatpush1.bf16.msra.mxu0 %v2452_v48  ;;  %1503 = vmatpush1.bf16.msra.mxu1 %v2455_v49  ;;  %v2542_v48 = vld [vmem:[#allocation5 + $0x520] ss:$16 sps:$4 sm:$0xff]   ;;  %v2545_v49 = vld [vmem:[#allocation5 + $0x528] ss:$16 sps:$4 sm:$0xff]  }
  0xa2   :  { %1340 = vmatprep.subr.bf16.mxu0 %v2460_v50  ;;  %1504 = vmatprep.subr.bf16.mxu1 %v2463_v51  ;;  %v2550_v50 = vld [vmem:[#allocation5 + $0x544] ss:$16 sps:$4 sm:$0xff]   ;;  %v2553_v51 = vld [vmem:[#allocation5 + $0x54c] ss:$16 sps:$4 sm:$0xff]  }
  0xa5   :  { %1341 = vmatpush1.bf16.msra.mxu0 %v2458_v52  ;;  %1505 = vmatpush1.bf16.msra.mxu1 %v2461_v53  ;;  %v2548_v52 = vld [vmem:[#allocation5 + $0x540] ss:$16 sps:$4 sm:$0xff]   ;;  %v2551_v53 = vld [vmem:[#allocation5 + $0x548] ss:$16 sps:$4 sm:$0xff]  }
  0xa6   :  { %1342 = vmatprep.subr.bf16.mxu0 %v2466_v54  ;;  %1506 = vmatprep.subr.bf16.mxu1 %v2469_v55  ;;  %v2556_v54 = vld [vmem:[#allocation5 + $0x564] ss:$16 sps:$4 sm:$0xff]   ;;  %v2559_v55 = vld [vmem:[#allocation5 + $0x56c] ss:$16 sps:$4 sm:$0xff]  }
  0xa9   :  { %1343 = vmatpush1.bf16.msra.mxu0 %v2464_v56  ;;  %1507 = vmatpush1.bf16.msra.mxu1 %v2467_v57  ;;  %v2554_v56 = vld [vmem:[#allocation5 + $0x560] ss:$16 sps:$4 sm:$0xff]   ;;  %v2557_v57 = vld [vmem:[#allocation5 + $0x568] ss:$16 sps:$4 sm:$0xff]  }
  0xaa   :  { %1344 = vmatprep.subr.bf16.mxu0 %v2472_v58  ;;  %1508 = vmatprep.subr.bf16.mxu1 %v2475_v59  ;;  %v2562_v58 = vld [vmem:[#allocation5 + $0x584] ss:$16 sps:$4 sm:$0xff]   ;;  %v2565_v59 = vld [vmem:[#allocation5 + $0x58c] ss:$16 sps:$4 sm:$0xff]  }
  0xad   :  { %1345 = vmatpush1.bf16.msra.mxu0 %v2470_v60  ;;  %1509 = vmatpush1.bf16.msra.mxu1 %v2473_v61  ;;  %v2560_v60 = vld [vmem:[#allocation5 + $0x580] ss:$16 sps:$4 sm:$0xff]   ;;  %v2563_v61 = vld [vmem:[#allocation5 + $0x588] ss:$16 sps:$4 sm:$0xff]  }
  0xae   :  { %1346 = vmatprep.subr.bf16.mxu0 %v2478_v62  ;;  %1510 = vmatprep.subr.bf16.mxu1 %v2481_v63  ;;  %v2568_v62 = vld [vmem:[#allocation5 + $0x5a4] ss:$16 sps:$4 sm:$0xff]   ;;  %v2571_v63 = vld [vmem:[#allocation5 + $0x5ac] ss:$16 sps:$4 sm:$0xff]  }
  0xb1   :  { %1347 = vmatpush1.bf16.msra.mxu0 %v2476_v0  ;;  %1511 = vmatpush1.bf16.msra.mxu1 %v2479_v1  ;;  %v2566_v0 = vld [vmem:[#allocation5 + $0x5a0] ss:$16 sps:$4 sm:$0xff]   ;;  %v2569_v1 = vld [vmem:[#allocation5 + $0x5a8] ss:$16 sps:$4 sm:$0xff]  }
  0xb2   :  { %1348 = vmatprep.subr.bf16.mxu0 %v2484_v2  ;;  %1512 = vmatprep.subr.bf16.mxu1 %v2487_v3  ;;  %v2574_v2 = vld [vmem:[#allocation5 + $0x5c4] ss:$16 sps:$4 sm:$0xff]   ;;  %v2577_v3 = vld [vmem:[#allocation5 + $0x5cc] ss:$16 sps:$4 sm:$0xff]  }
  0xb5   :  { %1349 = vmatpush1.bf16.msra.mxu0 %v2482_v4  ;;  %1513 = vmatpush1.bf16.msra.mxu1 %v2485_v5  ;;  %v2572_v4 = vld [vmem:[#allocation5 + $0x5c0] ss:$16 sps:$4 sm:$0xff]   ;;  %v2575_v5 = vld [vmem:[#allocation5 + $0x5c8] ss:$16 sps:$4 sm:$0xff]  }
  0xb6   :  { %1359 = vmatprep.subr.bf16.mxu0 %v2490_v6  ;;  %1523 = vmatprep.subr.bf16.mxu1 %v2493_v8  ;;  %v2580_v6 = vld [vmem:[#allocation5 + $0x5e4] ss:$16 sps:$4 sm:$0xff]   ;;  %v2578_v8 = vld [vmem:[#allocation5 + $0x5e0] ss:$16 sps:$4 sm:$0xff]  }
  0xb8   :  { %1351 = vmatmul.mubr.bf16.vlgmr.msra.gmra.mrb[0].mxu0 %v70_v10  ;;  %1515 = vmatmul.mubr.bf16.vlgmr.msra.gmra.mrb[0].mxu1 %v70_v10  ;;  %v65_v10 = vld [vmem:[#allocation2 + $0x20] sm:$0xff] }
  0xb9   :  { %1360 = vmatpush1.bf16.msra.mxu0 %v2488_v9  ;;  %1524 = vmatpush1.bf16.msra.mxu1 %v2491_v11  ;;  %v2581_v9 = vld [vmem:[#allocation5 + $0x5e8] ss:$16 sps:$4 sm:$0xff]   ;;  %v2586_v11 = vld [vmem:[#allocation5 + $0x604] ss:$16 sps:$4 sm:$0xff]  }
  0xba   :  { %1361 = vmatprep.subr.bf16.mxu0 %v2496_v12  ;;  %1525 = vmatprep.subr.bf16.mxu1 %v2499_v13  ;;  %v2589_v12 = vld [vmem:[#allocation5 + $0x60c] ss:$16 sps:$4 sm:$0xff]   ;;  %v72_v13 = vpack.c.bf16 %v65_v10, %v65_v10 }
  0xbb   :  { %1391 = vmatprep.mubr.bf16.mxu0 %v73_v15  ;;  %1555 = vmatprep.mubr.bf16.mxu1 %v73_v15  ;;  %v2587_v15 = vld [vmem:[#allocation5 + $0x608] ss:$16 sps:$4 sm:$0xff]  }
  0xbd   :  { %1362 = vmatpush1.bf16.msra.mxu0 %v2494_v16  ;;  %1526 = vmatpush1.bf16.msra.mxu1 %v2497_v17  ;;  %v2590_v16 = vld [vmem:[#allocation7 + $0x40] sm:$0xff]  }
  0xbe   :  { %1363 = vmatprep.subr.bf16.mxu0 %v2502_v18  ;;  %1527 = vmatprep.subr.bf16.mxu1 %v2505_v19  ;;  %v2591_v17 = vld [vmem:[#allocation7 + $0xc0] sm:$0xff]   ;;  %v2727_v18 = vmov 0   ;;  %v67_v19 = vld [vmem:[#allocation2 + $0x30] sm:$0xff] }
  0xc1   :  { %1364 = vmatpush1.bf16.msra.mxu0 %v2500_v20  ;;  %1528 = vmatpush1.bf16.msra.mxu1 %v2503_v21  ;;  %v74_v20 = vpack.c.bf16 %v67_v19, %v67_v19  ;;  %v2592_v21 = vld [vmem:[#allocation7] sm:$0xff]  }
  0xc2   :  { %1365 = vmatprep.subr.bf16.mxu0 %v2508_v22  ;;  %1529 = vmatprep.subr.bf16.mxu1 %v2511_v23  ;;  %v2593_v22 = vld [vmem:[#allocation7 + $0x80] sm:$0xff]   ;;  %v2594_v23 = vld [vmem:[#allocation7 + $0x48] sm:$0xff]  }
  0xc5   :  { %1366 = vmatpush1.bf16.msra.mxu0 %v2506_v24  ;;  %1530 = vmatpush1.bf16.msra.mxu1 %v2509_v25  ;;  %v2595_v24 = vld [vmem:[#allocation7 + $0xc8] sm:$0xff]  }
  0xc6   :  { %1367 = vmatprep.subr.bf16.mxu0 %v2514_v26  ;;  %1531 = vmatprep.subr.bf16.mxu1 %v2517_v27  ;;  %v2596_v25 = vld [vmem:[#allocation7 + $0x8] sm:$0xff]   ;;  %v2598_v27 = vld [vmem:[#allocation7 + $0x50] sm:$0xff]  }
  0xc7   :  { %v2597_v26 = vld [vmem:[#allocation7 + $0x88] sm:$0xff]  }
  0xc9   :  { %1368 = vmatpush1.bf16.msra.mxu0 %v2512_v28  ;;  %1532 = vmatpush1.bf16.msra.mxu1 %v2515_v29  ;;  %v2599_v28 = vld [vmem:[#allocation7 + $0xd0] sm:$0xff]  }
  0xca   :  { %1369 = vmatprep.subr.bf16.mxu0 %v2520_v30  ;;  %1533 = vmatprep.subr.bf16.mxu1 %v2523_v31  ;;  %v2600_v29 = vld [vmem:[#allocation7 + $0x10] sm:$0xff]   ;;  %v2602_v31 = vld [vmem:[#allocation7 + $0x58] sm:$0xff]  }
  0xcb   :  { %v2601_v30 = vld [vmem:[#allocation7 + $0x90] sm:$0xff]  }
  0xcd   :  { %1370 = vmatpush1.bf16.msra.mxu0 %v2518_v32  ;;  %1534 = vmatpush1.bf16.msra.mxu1 %v2521_v33  ;;  %v2603_v32 = vld [vmem:[#allocation7 + $0xd8] sm:$0xff]  }
  0xce   :  { %1371 = vmatprep.subr.bf16.mxu0 %v2526_v34  ;;  %1535 = vmatprep.subr.bf16.mxu1 %v2529_v35  ;;  %v2604_v33 = vld [vmem:[#allocation7 + $0x18] sm:$0xff]   ;;  %v2606_v35 = vld [vmem:[#allocation7 + $0x60] sm:$0xff]  }
  0xcf   :  { %v2605_v34 = vld [vmem:[#allocation7 + $0x98] sm:$0xff]  }
  0xd1   :  { %1372 = vmatpush1.bf16.msra.mxu0 %v2524_v36  ;;  %1536 = vmatpush1.bf16.msra.mxu1 %v2527_v37  ;;  %v2607_v36 = vld [vmem:[#allocation7 + $0xe0] sm:$0xff]  }
  0xd2   :  { %1373 = vmatprep.subr.bf16.mxu0 %v2532_v38  ;;  %1537 = vmatprep.subr.bf16.mxu1 %v2535_v39  ;;  %v2608_v37 = vld [vmem:[#allocation7 + $0x20] sm:$0xff]   ;;  %v2610_v39 = vld [vmem:[#allocation7 + $0x68] sm:$0xff]  }
  0xd3   :  { %v2609_v38 = vld [vmem:[#allocation7 + $0xa0] sm:$0xff]  }
  0xd5   :  { %1374 = vmatpush1.bf16.msra.mxu0 %v2530_v40  ;;  %1538 = vmatpush1.bf16.msra.mxu1 %v2533_v41  ;;  %v2611_v40 = vld [vmem:[#allocation7 + $0xe8] sm:$0xff]  }
  0xd6   :  { %1375 = vmatprep.subr.bf16.mxu0 %v2538_v42  ;;  %1539 = vmatprep.subr.bf16.mxu1 %v2541_v43  ;;  %v2612_v41 = vld [vmem:[#allocation7 + $0x28] sm:$0xff]   ;;  %v2614_v43 = vld [vmem:[#allocation7 + $0x70] sm:$0xff]  }
  0xd7   :  { %v2613_v42 = vld [vmem:[#allocation7 + $0xa8] sm:$0xff]  }
  0xd9   :  { %1376 = vmatpush1.bf16.msra.mxu0 %v2536_v44  ;;  %1540 = vmatpush1.bf16.msra.mxu1 %v2539_v45  ;;  %v2615_v44 = vld [vmem:[#allocation7 + $0xf0] sm:$0xff]  }
  0xda   :  { %1377 = vmatprep.subr.bf16.mxu0 %v2544_v46  ;;  %1541 = vmatprep.subr.bf16.mxu1 %v2547_v47  ;;  %v2616_v45 = vld [vmem:[#allocation7 + $0x30] sm:$0xff]   ;;  %v2618_v47 = vld [vmem:[#allocation7 + $0x78] sm:$0xff]  }
  0xdb   :  { %v2617_v46 = vld [vmem:[#allocation7 + $0xb0] sm:$0xff]  }
  0xdd   :  { %1378 = vmatpush1.bf16.msra.mxu0 %v2542_v48  ;;  %1542 = vmatpush1.bf16.msra.mxu1 %v2545_v49  ;;  %v2619_v48 = vld [vmem:[#allocation7 + $0xf8] sm:$0xff]  }
  0xde   :  { %1379 = vmatprep.subr.bf16.mxu0 %v2550_v50  ;;  %1543 = vmatprep.subr.bf16.mxu1 %v2553_v51  ;;  %v2620_v49 = vld [vmem:[#allocation7 + $0x38] sm:$0xff]   ;;  %v273_v51 = vlaneseq }
  0xdf   :  { %v2621_v50 = vld [vmem:[#allocation7 + $0xb8] sm:$0xff]  }
  0xe1   :  { %1380 = vmatpush1.bf16.msra.mxu0 %v2548_v52  ;;  %1544 = vmatpush1.bf16.msra.mxu1 %v2551_v53  ;;  %v274_v52 = vshrl.u32 %v273_v51, 7 }
  0xe2   :  { %1381 = vmatprep.subr.bf16.mxu0 %v2556_v54  ;;  %1545 = vmatprep.subr.bf16.mxu1 %v2559_v55  ;;  %v271_v55 = vld [vmem:[%s2815_s2] sm:$0xf] }
  0xe3   :  { %v275_v53 = vsub.s32 0, %v274_v52  ;;  %v283_v54 = vsub.s32 2, %v274_v52 }
  0xe5   :  { %1382 = vmatpush1.bf16.msra.mxu0 %v2554_v56  ;;  %1546 = vmatpush1.bf16.msra.mxu1 %v2557_v57  ;;  %v279_v56 = vsub.s32 1, %v274_v52  ;;  %v287_v57 = vsub.s32 3, %v274_v52 }
  0xe6   :  { %1383 = vmatprep.subr.bf16.mxu0 %v2562_v58  ;;  %1547 = vmatprep.subr.bf16.mxu1 %v2565_v59  ;;  %v276_v58 = vrot.slane %v271_v55, %v275_v53  ;;  %v284_v59 = vrot.slane %v271_v55, %v283_v54 }
  0xe9   :  { %1384 = vmatpush1.bf16.msra.mxu0 %v2560_v60  ;;  %1548 = vmatpush1.bf16.msra.mxu1 %v2563_v61  ;;  %v280_v60 = vrot.slane %v271_v55, %v279_v56  ;;  %v288_v61 = vrot.slane %v271_v55, %v287_v57 }
  0xea   :  { %1385 = vmatprep.subr.bf16.mxu0 %v2568_v62  ;;  %1549 = vmatprep.subr.bf16.mxu1 %v2571_v63 }
  0xed   :  { %1386 = vmatpush1.bf16.msra.mxu0 %v2566_v0  ;;  %1550 = vmatpush1.bf16.msra.mxu1 %v2569_v1 }
  0xee   :  { %1387 = vmatprep.subr.bf16.mxu0 %v2574_v2  ;;  %1551 = vmatprep.subr.bf16.mxu1 %v2577_v3 }
  0xf1   :  { %1388 = vmatpush1.bf16.msra.mxu0 %v2572_v4  ;;  %1552 = vmatpush1.bf16.msra.mxu1 %v2575_v5 }
  0xf2   :  { %1389 = vmatprep.subr.bf16.mxu0 %v2580_v6  ;;  %1553 = vmatprep.subr.bf16.mxu1 %v2583_v7 }
  0xf5   :  { %1390 = vmatpush1.bf16.msra.mxu0 %v2578_v8  ;;  %1554 = vmatpush1.bf16.msra.mxu1 %v2581_v9 }
  0xf6   :  { %1400 = vmatprep.subr.bf16.mxu0 %v2586_v11  ;;  %1564 = vmatprep.subr.bf16.mxu1 %v2589_v12 }
  0xf8   :  { %1392 = vmatmul.mubr.bf16.vlgmr.msra.gmra.mrb[0].mxu0 %v72_v13  ;;  %1556 = vmatmul.mubr.bf16.vlgmr.msra.gmra.mrb[0].mxu1 %v72_v13 }
  0xf9   :  { %1401 = vmatpush1.bf16.msra.mxu0 %v2584_v14  ;;  %1565 = vmatpush1.bf16.msra.mxu1 %v2587_v15 }
  0xfa   :  { %1432 = vmatprep.mubr.bf16.mxu0 %v2727_v18  ;;  %1596 = vmatprep.mubr.bf16.mxu1 %v2727_v18 }
  0xfb   :  { %2215 = vmatprep.subr.bf16.mxu0 %v2590_v16  ;;  %2237 = vmatprep.subr.bf16.mxu1 %v2591_v17 }
 0x104   :  { %2180 = vmatmul.mubr.msk.bf16.vlgmr.msra.gmra.mrb[0].mxu0 %vm1273_vm0, %v74_v20  ;;  %2181 = vmatmul.mubr.msk.bf16.vlgmr.msra.gmra.mrb[0].mxu1 %vm1273_vm0, %v74_v20  ;;  %v2182_v20 = vld [vmem:[%s2817_s4] ss:$0 sm:$0xff]  ;;  %s2728_s4 = smov [#allocation8]  }
 0x105   :  { %2216 = vmatpush3.bf16.msra.mxu0 %v2592_v21  ;;  %2238 = vmatpush3.bf16.msra.mxu1 %v2593_v22  ;;  %s1974_s8 = sshll.u32 %s2728_s4, 4  ;;  %s1975_s8 = int_to_ptr.vmem [resolvable:$true] %s1974_s8 }
 0x106   :  { %2217 = vmatprep.subr.bf16.mxu0 %v2594_v23  ;;  %2239 = vmatprep.subr.bf16.mxu1 %v2595_v24  ;;  %s2692_s9 = scalar_lea.vmem %s1975_s8, 64  ;;  %p2697_p11 = scmp.lt.s32.totalorder %s1975_s8, %s1975_s8 }
 0x107   :  { %p2693_p10 = scmp.ne.s32.totalorder %s1975_s8, %s2692_s9  ;;  %p2698_p12 = scmp.lt.s32.totalorder %s2692_s9, %s2692_s9 }
 0x109   :  { %2218 = vmatpush3.bf16.msra.mxu0 %v2596_v25  ;;  %2240 = vmatpush3.bf16.msra.mxu1 %v2597_v26  ;;  %p2699_p13 = por %p2698_p12, %p2697_p11 }
 0x10a   :  { %2219 = vmatprep.subr.bf16.mxu0 %v2598_v27  ;;  %2241 = vmatprep.subr.bf16.mxu1 %v2599_v28 }
 0x10b   :  { %p2700_p0 = pnand %p2699_p13, %p2693_p10 }
 0x10d   :  { %2220 = vmatpush3.bf16.msra.mxu0 %v2600_v29  ;;  %2242 = vmatpush3.bf16.msra.mxu1 %v2601_v30 }
 0x10e   :  { %2221 = vmatprep.subr.bf16.mxu0 %v2602_v31  ;;  %2243 = vmatprep.subr.bf16.mxu1 %v2603_v32 }
 0x111   :  { %2222 = vmatpush3.bf16.msra.mxu0 %v2604_v33  ;;  %2244 = vmatpush3.bf16.msra.mxu1 %v2605_v34 }
 0x112   :  { %2223 = vmatprep.subr.bf16.mxu0 %v2606_v35  ;;  %2245 = vmatprep.subr.bf16.mxu1 %v2607_v36 }
 0x115   :  { %2224 = vmatpush3.bf16.msra.mxu0 %v2608_v37  ;;  %2246 = vmatpush3.bf16.msra.mxu1 %v2609_v38 }
 0x116   :  { %2225 = vmatprep.subr.bf16.mxu0 %v2610_v39  ;;  %2247 = vmatprep.subr.bf16.mxu1 %v2611_v40 }
 0x119   :  { %2226 = vmatpush3.bf16.msra.mxu0 %v2612_v41  ;;  %2248 = vmatpush3.bf16.msra.mxu1 %v2613_v42 }
 0x11a   :  { %2227 = vmatprep.subr.bf16.mxu0 %v2614_v43  ;;  %2249 = vmatprep.subr.bf16.mxu1 %v2615_v44 }
 0x11d   :  { %2228 = vmatpush3.bf16.msra.mxu0 %v2616_v45  ;;  %2250 = vmatpush3.bf16.msra.mxu1 %v2617_v46 }
 0x11e   :  { %2229 = vmatprep.subr.bf16.mxu0 %v2618_v47  ;;  %2251 = vmatprep.subr.bf16.mxu1 %v2619_v48 }
 0x121   :  { %2230 = vmatpush3.bf16.msra.mxu0 %v2620_v49  ;;  %2252 = vmatpush3.bf16.msra.mxu1 %v2621_v50 }
 0x1d7   :  { %v1434_v62 = vpop.f32.mrb[0].mxu0  ;;  %v1598_v63 = vpop.f32.mrb[0].mxu1 }
 0x1d8   :  { %v2259_v0 = vadd.f32 %v1434_v62, %v276_v58  ;;  %v2261_v1 = vadd.f32 %v1598_v63, %v284_v59  ;;  %v1436_v2 = vpop.f32.mrb[1].mxu0  ;;  %v1600_v3 = vpop.f32.mrb[1].mxu1 }
 0x1d9   :  { %v2260_v4 = vadd.f32 %v1436_v2, %v280_v60  ;;  %v2262_v5 = vadd.f32 %v1600_v3, %v288_v61  ;;  %v1438_v6 = vpop.f32.mrb[2].mxu0  ;;  %v1602_v7 = vpop.f32.mrb[2].mxu1 }
 0x1da   :  { %v1605_v8 = vmax.f32 %v2259_v0, 0.0  ;;  %v1607_v9 = vmax.f32 %v2261_v1, 0.0  ;;  %v1439_v10 = vpop.f32.mrb[3].mxu0  ;;  %v1603_v11 = vpop.f32.mrb[3].mxu1 }
 0x1db   :  { %v1606_v12 = vmax.f32 %v2260_v4, 0.0  ;;  %v1608_v13 = vmax.f32 %v2262_v5, 0.0 }
 0x1dc   :  { %v1609_v16 = vpack.c.bf16 %v1605_v8, %v1605_v8  ;;  %v1611_v17 = vpack.c.bf16 %v1607_v9, %v1607_v9 }
 0x1dd   :  { %v1610_v14 = vpack.c.bf16 %v1606_v12, %v1606_v12  ;;  %v1612_v15 = vpack.c.bf16 %v1608_v13, %v1608_v13 }
 0x1df   :  { %1908 = vmatprep.mubr.bf16.mxu0 %v1610_v14  ;;  %1948 = vmatprep.mubr.bf16.mxu1 %v1612_v15 }
 0x1e0   :  { %1909 = vmatmul.mubr.bf16.vlgmr.msra.gmra.mrb[4].mxu0 %v1609_v16  ;;  %1949 = vmatmul.mubr.bf16.vlgmr.msra.gmra.mrb[4].mxu1 %v1611_v17 }
 0x2b3   :  { %v2231_v18 = vpop.f32.mrb[4].mxu0  ;;  %v2253_v19 = vpop.f32.mrb[4].mxu1 }
 0x2b4   :  { %v2232_v21 = vpop.f32.mrb[5].mxu0  ;;  %v2254_v22 = vpop.f32.mrb[5].mxu1 }
 0x2b5   :  { %v2233_v23 = vadd.f32 %v2232_v21, %v2231_v18  ;;  %v2255_v24 = vadd.f32 %v2254_v22, %v2253_v19  ;;  %v2234_v25 = vpop.f32.mrb[6].mxu0  ;;  %v2256_v26 = vpop.f32.mrb[6].mxu1 }
 0x2b6   :  { %v2235_v27 = vpop.f32.mrb[7].mxu0  ;;  %v2257_v28 = vpop.f32.mrb[7].mxu1 }
 0x2b7   :  { %v1911_v29 = vadd.f32 %v2233_v23, %v2182_v20 }
 0x2b9   :  { %v1951_v30 = vadd.f32 %v2255_v24, %v1911_v29 }
 0x2bb   :  { %1956 = vmax.xlane.f32.xlu0 %v1951_v30 }
 0x348   :  { %v1957_v31 = vpop.xlane.xlu0 %1956 }
 0x349   :  { %v1958_v32 = vsub.f32 %v1951_v30, %v1957_v31 }
 0x34b   :  { %v1959_v33 = vmul.f32 1.442695, %v1958_v32 }
 0x34d   :  { %2622 = vpow2.f32 %v1959_v33 }
 0x357   :  { %v2623_v34 = vpop.eup %2622 }
 0x358   :  { %1961 = vadd.xlane.f32.xlu0 %v2623_v34 }
 0x3e5   :  { %v1962_v35 = vpop.xlane.xlu0 %1961 }
 0x3e6   :  { %2624 = vlog2.f32 %v1962_v35 }
 0x3f0   :  { %v2625_v36 = vpop.eup %2624 }
 0x3f1   :  { %v1964_v37 = vmul.f32 0.6931472, %v2625_v36 }
 0x3f3   :  { %v1965_v38 = vsub.f32 %v1958_v32, %v1964_v37 }
 0x3f5   :  { %v1966_v39 = vpack.c.bf16 %v1965_v38, %v1965_v38 }
 0x3f7   :  { %1967 = vst [vmem:[#allocation8] sm:$0xf] %v1966_v39 }
 0x3f8   :  { %2703 = shalt.err (!%p2700_p0)
}
 0x3f9   :  { %s2704_s12 = scalar_lea.hbm %s2818_s5, 64 }
 0x3fa   :  { %p2705_p1 = scmp.ne.s32.totalorder %s2818_s5, %s2704_s12  ;;  %p2708_p2 = scmp.lt.u32.totalorder %s2704_s12, %s2818_s5 }
 0x3fc   :  { %p2710_p3 = pnand %p2708_p2, %p2705_p1 }
 0x3fe   :  { %2713 = shalt.err (!%p2710_p3)
}
 0x3ff   :  { %1977 = dma.vmem_to_hbm [thread:$0]  %s1975_s8, 64, %s2818_s5, [#allocation4]  }
 0x400   :  { %2718 = dma.done.wait [#allocation4], 64  }
 0x401   :  { %2719 = vsyncadd [#allocation4], 4294967232 }
 0x402   :  { %1981 = vsyncpa [#allocation3], 1 }
 0x403   :  { %1982 = vsyncpa [#allocation6], 1 }
 0x404   :  { %1983 = vsyncpa [#allocation4], 1 }

// kernel: tpu_custom_call.1
= control target key start
LH: loop header
LB: loop body
LE: loop exit
PB: predicated region body
PF: predicated region fallthrough
CT: control target
= control target key end

     0   :  { %10 = vsyncpa [#allocation3], 0  ;;  %s2813_s0 = inlined_call_operand.hbm [shape: f32[8,784], index: 0, kind: input, shape index: {}]   ;;  %s2814_s1 = inlined_call_operand.hbm [shape: bf16[784,512], index: 1, kind: input, shape index: {}]   ;;  %s2815_s2 = inlined_call_operand.vmem [shape: f32[1,512], index: 2, kind: input, shape index: {}]   ;;  %s2816_s3 = inlined_call_operand.hbm [shape: bf16[512,128], index: 3, kind: input, shape index: {}]   ;;  %s2817_s4 = inlined_call_operand.vmem [shape: f32[1,128], index: 4, kind: input, shape index: {}]   ;;  %s2818_s5 = inlined_call_operand.hbm [shape: bf16[8,128], index: 5, kind: output, shape index: {}]  }
   0x1   :  { %11 = vsyncpa [#allocation6], 0 }
   0x2   :  { %12 = vsyncpa [#allocation4], 0  ;;  %s2720_s18 = smov [#allocation5]   ;;  %s2626_s22 = scalar_lea.hbm %s2814_s1, 25088 }
   0x3   :  { %s28_s19 = sshll.u32 %s2720_s18, 4  ;;  %p2627_p0 = scmp.ne.s32.totalorder %s2814_s1, %s2626_s22  ;;  %s29_s19 = int_to_ptr.vmem [resolvable:$true] %s28_s19 }
   0x4   :  { %p2630_p1 = scmp.lt.u32.totalorder %s2626_s22, %s2814_s1 }
   0x6   :  { %p2632_p2 = pnand %p2630_p1, %p2627_p0 }
   0x8   :  { %2635 = shalt.err (!%p2632_p2)
}
   0x9   :  { %s2636_s27 = scalar_lea.vmem %s29_s19, 25088  ;;  %p2641_p4 = scmp.lt.s32.totalorder %s29_s19, %s29_s19 }
   0xa   :  { %p2637_p3 = scmp.ne.s32.totalorder %s29_s19, %s2636_s27  ;;  %p2642_p5 = scmp.lt.s32.totalorder %s2636_s27, %s2636_s27 }
   0xc   :  { %p2643_p6 = por %p2642_p5, %p2641_p4 }
   0xe   :  { %p2644_p7 = pnand %p2643_p6, %p2637_p3 }
  0x10   :  { %2647 = shalt.err (!%p2644_p7)
}
  0x11   :  { %s2721_s28 = smov 256   ;;  %s2722_s29 = smov 16  }
  0x12   :  { %34 = dma.hbm_to_vmem [thread:$0]  %s2814_s1, 25088, %s29_s19, [#allocation6], %s2721_s28, %s2721_s28, %s2722_s29  }
  0x13   :  { %s2723_s7 = smov [#allocation2]   ;;  %s2724_s9 = smov [#allocation7]  }
  0x14   :  { %s19_s8 = sshll.u32 %s2723_s7, 4  ;;  %s42_s10 = sshll.u32 %s2724_s9, 4  ;;  %s20_s8 = int_to_ptr.vmem [resolvable:$true] %s19_s8  ;;  %s43_s10 = int_to_ptr.vmem [resolvable:$true] %s42_s10 }
  0x15   :  { %s2648_s13 = scalar_lea.hbm %s2813_s0, 896 }
  0x16   :  { %p2649_p8 = scmp.ne.s32.totalorder %s2813_s0, %s2648_s13  ;;  %p2652_p9 = scmp.lt.u32.totalorder %s2648_s13, %s2813_s0 }
  0x18   :  { %p2654_p10 = pnand %p2652_p9, %p2649_p8 }
  0x1a   :  { %2657 = shalt.err (!%p2654_p10)
}
  0x1b   :  { %s2658_s1 = scalar_lea.vmem %s20_s8, 896  ;;  %p2663_p12 = scmp.lt.s32.totalorder %s20_s8, %s20_s8 }
  0x1c   :  { %p2659_p11 = scmp.ne.s32.totalorder %s20_s8, %s2658_s1  ;;  %p2664_p13 = scmp.lt.s32.totalorder %s2658_s1, %s2658_s1 }
  0x1e   :  { %p2665_p0 = por %p2664_p13, %p2663_p12 }
  0x20   :  { %p2666_p1 = pnand %p2665_p0, %p2659_p11 }
  0x22   :  { %2669 = shalt.err (!%p2666_p1)
}
  0x23   :  { %22 = dma.hbm_to_vmem [thread:$0]  %s2813_s0, 896, %s20_s8, [#allocation3]  }
  0x24   :  { %s2670_s22 = scalar_lea.hbm %s2816_s3, 4096 }
  0x25   :  { %p2671_p2 = scmp.ne.s32.totalorder %s2816_s3, %s2670_s22  ;;  %p2674_p3 = scmp.lt.u32.totalorder %s2670_s22, %s2816_s3 }
  0x27   :  { %p2676_p4 = pnand %p2674_p3, %p2671_p2 }
  0x29   :  { %2679 = shalt.err (!%p2676_p4)
}
  0x2a   :  { %s2680_s27 = scalar_lea.vmem %s43_s10, 4096  ;;  %p2685_p6 = scmp.lt.s32.totalorder %s43_s10, %s43_s10 }
  0x2b   :  { %p2681_p5 = scmp.ne.s32.totalorder %s43_s10, %s2680_s27  ;;  %p2686_p7 = scmp.lt.s32.totalorder %s2680_s27, %s2680_s27 }
  0x2d   :  { %p2687_p8 = por %p2686_p7, %p2685_p6 }
  0x2f   :  { %p2688_p9 = pnand %p2687_p8, %p2681_p5 }
  0x31   :  { %2691 = shalt.err (!%p2688_p9)
}
  0x32   :  { %s2725_s0 = smov 64   ;;  %s2726_s28 = smov 4  }
  0x33   :  { %48 = dma.hbm_to_vmem [thread:$0]  %s2816_s3, 4096, %s43_s10, [#allocation6], %s2725_s0, %s2725_s0, %s2726_s28  }
  0x34   :  { %2714 = dma.done.wait [#allocation3], 896  }
  0x35   :  { %2715 = vsyncadd [#allocation3], 4294966400 }
  0x36   :  { %2716 = dma.done.wait [#allocation6], 29184  }
  0x37   :  { %2717 = vsyncadd [#allocation6], 4294938112  ;;  %v2296_v0 = vld [vmem:[#allocation5 + $0x4] ss:$16 sps:$4 sm:$0xff]   ;;  %v2298_v1 = vld [vmem:[#allocation5 + $0xc] ss:$16 sps:$4 sm:$0xff]  }
  0x38   :  { %1277 = vmatprep.subr.bf16.mxu0 %v2296_v0  ;;  %v2300_v2 = vld [vmem:[#allocation5] ss:$16 sps:$4 sm:$0xff]   ;;  %v2301_v3 = vld [vmem:[#allocation5 + $0x8] ss:$16 sps:$4 sm:$0xff]   ;;  %1441 = vmatprep.subr.bf16.mxu1 %v2298_v1  ;;  %v2302_v4 = vld [vmem:[#allocation5 + $0x24] ss:$16 sps:$4 sm:$0xff]  }
  0x39   :  { %1278 = vmatpush1.bf16.msra.mxu0 %v2300_v2  ;;  %1442 = vmatpush1.bf16.msra.mxu1 %v2301_v3  ;;  %v2304_v5 = vld [vmem:[#allocation5 + $0x2c] ss:$16 sps:$4 sm:$0xff]   ;;  %v2306_v6 = vld [vmem:[#allocation5 + $0x20] ss:$16 sps:$4 sm:$0xff]   ;;  %v2307_v7 = vld [vmem:[#allocation5 + $0x28] ss:$16 sps:$4 sm:$0xff]  }
  0x3a   :  { %1279 = vmatprep.subr.bf16.mxu0 %v2302_v4  ;;  %1443 = vmatprep.subr.bf16.mxu1 %v2304_v5  ;;  %v2308_v8 = vld [vmem:[#allocation5 + $0x44] ss:$16 sps:$4 sm:$0xff]   ;;  %v2310_v9 = vld [vmem:[#allocation5 + $0x4c] ss:$16 sps:$4 sm:$0xff]   ;;  %v2312_v10 = vld [vmem:[#allocation5 + $0x40] ss:$16 sps:$4 sm:$0xff]  }
  0x3b   :  { %v2313_v11 = vld [vmem:[#allocation5 + $0x48] ss:$16 sps:$4 sm:$0xff]   ;;  %v2314_v12 = vld [vmem:[#allocation5 + $0x64] ss:$16 sps:$4 sm:$0xff]   ;;  %v2316_v13 = vld [vmem:[#allocation5 + $0x6c] ss:$16 sps:$4 sm:$0xff]  }
  0x3c   :  { %v2318_v14 = vld [vmem:[#allocation5 + $0x60] ss:$16 sps:$4 sm:$0xff]   ;;  %v2319_v15 = vld [vmem:[#allocation5 + $0x68] ss:$16 sps:$4 sm:$0xff]   ;;  %v2320_v16 = vld [vmem:[#allocation5 + $0x84] ss:$16 sps:$4 sm:$0xff]  }
  0x3d   :  { %1280 = vmatpush1.bf16.msra.mxu0 %v2306_v6  ;;  %1444 = vmatpush1.bf16.msra.mxu1 %v2307_v7  ;;  %v2322_v17 = vld [vmem:[#allocation5 + $0x8c] ss:$16 sps:$4 sm:$0xff]   ;;  %v2324_v18 = vld [vmem:[#allocation5 + $0x80] ss:$16 sps:$4 sm:$0xff]   ;;  %v2325_v19 = vld [vmem:[#allocation5 + $0x88] ss:$16 sps:$4 sm:$0xff]  }
  0x3e   :  { %1281 = vmatprep.subr.bf16.mxu0 %v2308_v8  ;;  %1445 = vmatprep.subr.bf16.mxu1 %v2310_v9  ;;  %v2326_v20 = vld [vmem:[#allocation5 + $0xa4] ss:$16 sps:$4 sm:$0xff]   ;;  %v2328_v21 = vld [vmem:[#allocation5 + $0xac] ss:$16 sps:$4 sm:$0xff]   ;;  %v2330_v22 = vld [vmem:[#allocation5 + $0xa0] ss:$16 sps:$4 sm:$0xff]  }
  0x3f   :  { %v2331_v23 = vld [vmem:[#allocation5 + $0xa8] ss:$16 sps:$4 sm:$0xff]   ;;  %v2332_v24 = vld [vmem:[#allocation5 + $0xc4] ss:$16 sps:$4 sm:$0xff]   ;;  %v2334_v25 = vld [vmem:[#allocation5 + $0xcc] ss:$16 sps:$4 sm:$0xff]  }
  0x40   :  { %v2336_v26 = vld [vmem:[#allocation5 + $0xc0] ss:$16 sps:$4 sm:$0xff]   ;;  %v2337_v27 = vld [vmem:[#allocation5 + $0xc8] ss:$16 sps:$4 sm:$0xff]   ;;  %v2338_v28 = vld [vmem:[#allocation5 + $0xe4] ss:$16 sps:$4 sm:$0xff]  }
  0x41   :  { %1282 = vmatpush1.bf16.msra.mxu0 %v2312_v10  ;;  %1446 = vmatpush1.bf16.msra.mxu1 %v2313_v11  ;;  %v2340_v29 = vld [vmem:[#allocation5 + $0xec] ss:$16 sps:$4 sm:$0xff]   ;;  %v2342_v30 = vld [vmem:[#allocation5 + $0xe0] ss:$16 sps:$4 sm:$0xff]   ;;  %v2343_v31 = vld [vmem:[#allocation5 + $0xe8] ss:$16 sps:$4 sm:$0xff]  }
  0x42   :  { %1283 = vmatprep.subr.bf16.mxu0 %v2314_v12  ;;  %1447 = vmatprep.subr.bf16.mxu1 %v2316_v13  ;;  %v2344_v32 = vld [vmem:[#allocation5 + $0x104] ss:$16 sps:$4 sm:$0xff]   ;;  %v2346_v33 = vld [vmem:[#allocation5 + $0x10c] ss:$16 sps:$4 sm:$0xff]   ;;  %v2348_v34 = vld [vmem:[#allocation5 + $0x100] ss:$16 sps:$4 sm:$0xff]  }
  0x43   :  { %v2349_v35 = vld [vmem:[#allocation5 + $0x108] ss:$16 sps:$4 sm:$0xff]   ;;  %v2350_v36 = vld [vmem:[#allocation5 + $0x124] ss:$16 sps:$4 sm:$0xff]   ;;  %v2352_v37 = vld [vmem:[#allocation5 + $0x12c] ss:$16 sps:$4 sm:$0xff]  }
  0x44   :  { %v2354_v38 = vld [vmem:[#allocation5 + $0x120] ss:$16 sps:$4 sm:$0xff]   ;;  %v2355_v39 = vld [vmem:[#allocation5 + $0x128] ss:$16 sps:$4 sm:$0xff]   ;;  %v2356_v40 = vld [vmem:[#allocation5 + $0x144] ss:$16 sps:$4 sm:$0xff]  }
  0x45   :  { %1284 = vmatpush1.bf16.msra.mxu0 %v2318_v14  ;;  %1448 = vmatpush1.bf16.msra.mxu1 %v2319_v15  ;;  %v2358_v41 = vld [vmem:[#allocation5 + $0x14c] ss:$16 sps:$4 sm:$0xff]   ;;  %v2360_v42 = vld [vmem:[#allocation5 + $0x140] ss:$16 sps:$4 sm:$0xff]   ;;  %v2361_v43 = vld [vmem:[#allocation5 + $0x148] ss:$16 sps:$4 sm:$0xff]  }
  0x46   :  { %1285 = vmatprep.subr.bf16.mxu0 %v2320_v16  ;;  %1449 = vmatprep.subr.bf16.mxu1 %v2322_v17  ;;  %v2362_v44 = vld [vmem:[#allocation5 + $0x164] ss:$16 sps:$4 sm:$0xff]   ;;  %v2364_v45 = vld [vmem:[#allocation5 + $0x16c] ss:$16 sps:$4 sm:$0xff]   ;;  %v2366_v47 = vld [vmem:[#allocation5 + $0x160] ss:$16 sps:$4 sm:$0xff]  }
  0x47   :  { %v62_v46 = vld [vmem:[#allocation2 + $0x8] sm:$0xff]  ;;  %v2367_v49 = vld [vmem:[#allocation5 + $0x168] ss:$16 sps:$4 sm:$0xff]   ;;  %v2370_v51 = vld [vmem:[#allocation5 + $0x18c] ss:$16 sps:$4 sm:$0xff]   ;;  %vm1273_vm0 = vcmask 130048  }
  0x48   :  { %v69_v48 = vpack.c.bf16 %v62_v46, %v62_v46  ;;  %v2368_v50 = vld [vmem:[#allocation5 + $0x184] ss:$16 sps:$4 sm:$0xff]   ;;  %v2372_v52 = vld [vmem:[#allocation5 + $0x180] ss:$16 sps:$4 sm:$0xff]   ;;  %v2373_v53 = vld [vmem:[#allocation5 + $0x188] ss:$16 sps:$4 sm:$0xff]  }
  0x49   :  { %1286 = vmatpush1.bf16.msra.mxu0 %v2324_v18  ;;  %1450 = vmatpush1.bf16.msra.mxu1 %v2325_v19  ;;  %v2374_v54 = vld [vmem:[#allocation5 + $0x1a4] ss:$16 sps:$4 sm:$0xff]   ;;  %v2376_v55 = vld [vmem:[#allocation5 + $0x1ac] ss:$16 sps:$4 sm:$0xff]   ;;  %v2378_v56 = vld [vmem:[#allocation5 + $0x1a0] ss:$16 sps:$4 sm:$0xff]  }
  0x4a   :  { %1287 = vmatprep.subr.bf16.mxu0 %v2326_v20  ;;  %1451 = vmatprep.subr.bf16.mxu1 %v2328_v21  ;;  %v2379_v57 = vld [vmem:[#allocation5 + $0x1a8] ss:$16 sps:$4 sm:$0xff]   ;;  %v2380_v58 = vld [vmem:[#allocation5 + $0x1c4] ss:$16 sps:$4 sm:$0xff]   ;;  %v2382_v59 = vld [vmem:[#allocation5 + $0x1cc] ss:$16 sps:$4 sm:$0xff]  }
  0x4b   :  { %1309 = vmatprep.mubr.bf16.mxu0 %v69_v48  ;;  %1473 = vmatprep.mubr.bf16.mxu1 %v69_v48  ;;  %v2384_v60 = vld [vmem:[#allocation5 + $0x1c0] ss:$16 sps:$4 sm:$0xff]   ;;  %v2385_v61 = vld [vmem:[#allocation5 + $0x1c8] ss:$16 sps:$4 sm:$0xff]   ;;  %v2386_v62 = vld [vmem:[#allocation5 + $0x1e4] ss:$16 sps:$4 sm:$0xff]  }
  0x4c   :  { %v2388_v63 = vld [vmem:[#allocation5 + $0x1ec] ss:$16 sps:$4 sm:$0xff]   ;;  %v2390_v0 = vld [vmem:[#allocation5 + $0x1e0] ss:$16 sps:$4 sm:$0xff]   ;;  %v2391_v1 = vld [vmem:[#allocation5 + $0x1e8] ss:$16 sps:$4 sm:$0xff]  }
  0x4d   :  { %1288 = vmatpush1.bf16.msra.mxu0 %v2330_v22  ;;  %1452 = vmatpush1.bf16.msra.mxu1 %v2331_v23  ;;  %v61_v2 = vld [vmem:[#allocation2] sm:$0xff]  ;;  %v2394_v3 = vld [vmem:[#allocation5 + $0x204] ss:$16 sps:$4 sm:$0xff]   ;;  %v2392_v6 = vld [vmem:[#allocation5 + $0x200] ss:$16 sps:$4 sm:$0xff]  }
  0x4e   :  { %1289 = vmatprep.subr.bf16.mxu0 %v2332_v24  ;;  %1453 = vmatprep.subr.bf16.mxu1 %v2334_v25  ;;  %v2397_v4 = vld [vmem:[#allocation5 + $0x20c] ss:$16 sps:$4 sm:$0xff]   ;;  %v68_v5 = vpack.c.bf16 %v61_v2, %v61_v2  ;;  %v2395_v7 = vld [vmem:[#allocation5 + $0x208] ss:$16 sps:$4 sm:$0xff]   ;;  %v2400_v8 = vld [vmem:[#allocation5 + $0x224] ss:$16 sps:$4 sm:$0xff]  }
  0x4f   :  { %v2403_v9 = vld [vmem:[#allocation5 + $0x22c] ss:$16 sps:$4 sm:$0xff]   ;;  %v2398_v10 = vld [vmem:[#allocation5 + $0x220] ss:$16 sps:$4 sm:$0xff]   ;;  %v2401_v11 = vld [vmem:[#allocation5 + $0x228] ss:$16 sps:$4 sm:$0xff]  }
  0x50   :  { %v2406_v12 = vld [vmem:[#allocation5 + $0x244] ss:$16 sps:$4 sm:$0xff]   ;;  %v2409_v13 = vld [vmem:[#allocation5 + $0x24c] ss:$16 sps:$4 sm:$0xff]   ;;  %v2404_v14 = vld [vmem:[#allocation5 + $0x240] ss:$16 sps:$4 sm:$0xff]  }
  0x51   :  { %1290 = vmatpush1.bf16.msra.mxu0 %v2336_v26  ;;  %1454 = vmatpush1.bf16.msra.mxu1 %v2337_v27  ;;  %v2407_v15 = vld [vmem:[#allocation5 + $0x248] ss:$16 sps:$4 sm:$0xff]   ;;  %v2412_v16 = vld [vmem:[#allocation5 + $0x264] ss:$16 sps:$4 sm:$0xff]   ;;  %v2415_v17 = vld [vmem:[#allocation5 + $0x26c] ss:$16 sps:$4 sm:$0xff]  }
  0x52   :  { %1291 = vmatprep.subr.bf16.mxu0 %v2338_v28  ;;  %1455 = vmatprep.subr.bf16.mxu1 %v2340_v29  ;;  %v2410_v18 = vld [vmem:[#allocation5 + $0x260] ss:$16 sps:$4 sm:$0xff]   ;;  %v2413_v19 = vld [vmem:[#allocation5 + $0x268] ss:$16 sps:$4 sm:$0xff]   ;;  %v2418_v20 = vld [vmem:[#allocation5 + $0x284] ss:$16 sps:$4 sm:$0xff]  }
  0x53   :  { %v2421_v21 = vld [vmem:[#allocation5 + $0x28c] ss:$16 sps:$4 sm:$0xff]   ;;  %v2416_v22 = vld [vmem:[#allocation5 + $0x280] ss:$16 sps:$4 sm:$0xff]   ;;  %v2419_v23 = vld [vmem:[#allocation5 + $0x288] ss:$16 sps:$4 sm:$0xff]  }
  0x54   :  { %v2424_v24 = vld [vmem:[#allocation5 + $0x2a4] ss:$16 sps:$4 sm:$0xff]   ;;  %v2427_v25 = vld [vmem:[#allocation5 + $0x2ac] ss:$16 sps:$4 sm:$0xff]   ;;  %v2422_v26 = vld [vmem:[#allocation5 + $0x2a0] ss:$16 sps:$4 sm:$0xff]  }
  0x55   :  { %1292 = vmatpush1.bf16.msra.mxu0 %v2342_v30  ;;  %1456 = vmatpush1.bf16.msra.mxu1 %v2343_v31  ;;  %v2425_v27 = vld [vmem:[#allocation5 + $0x2a8] ss:$16 sps:$4 sm:$0xff]   ;;  %v2430_v28 = vld [vmem:[#allocation5 + $0x2c4] ss:$16 sps:$4 sm:$0xff]   ;;  %v2433_v29 = vld [vmem:[#allocation5 + $0x2cc] ss:$16 sps:$4 sm:$0xff]  }
  0x56   :  { %1293 = vmatprep.subr.bf16.mxu0 %v2344_v32  ;;  %1457 = vmatprep.subr.bf16.mxu1 %v2346_v33  ;;  %v64_v30 = vld [vmem:[#allocation2 + $0x18] sm:$0xff]  ;;  %v2431_v33 = vld [vmem:[#allocation5 + $0x2c8] ss:$16 sps:$4 sm:$0xff]  }
  0x57   :  { %v2428_v31 = vld [vmem:[#allocation5 + $0x2c0] ss:$16 sps:$4 sm:$0xff]   ;;  %v71_v32 = vpack.c.bf16 %v64_v30, %v64_v30  ;;  %v2454_v46 = vld [vmem:[#allocation5 + $0x344] ss:$16 sps:$4 sm:$0xff]  }
  0x58   :  { %v2452_v48 = vld [vmem:[#allocation5 + $0x340] ss:$16 sps:$4 sm:$0xff]   ;;  %v2484_v2 = vld [vmem:[#allocation5 + $0x3e4] ss:$16 sps:$4 sm:$0xff]  }
  0x59   :  { %1294 = vmatpush1.bf16.msra.mxu0 %v2348_v34  ;;  %1458 = vmatpush1.bf16.msra.mxu1 %v2349_v35  ;;  %v2436_v34 = vld [vmem:[#allocation5 + $0x2e4] ss:$16 sps:$4 sm:$0xff]   ;;  %v2439_v35 = vld [vmem:[#allocation5 + $0x2ec] ss:$16 sps:$4 sm:$0xff]  }
  0x5a   :  { %1295 = vmatprep.subr.bf16.mxu0 %v2350_v36  ;;  %1459 = vmatprep.subr.bf16.mxu1 %v2352_v37  ;;  %v2434_v36 = vld [vmem:[#allocation5 + $0x2e0] ss:$16 sps:$4 sm:$0xff]   ;;  %v2437_v37 = vld [vmem:[#allocation5 + $0x2e8] ss:$16 sps:$4 sm:$0xff]   ;;  %v2520_v30 = vld [vmem:[#allocation5 + $0x4a4] ss:$16 sps:$4 sm:$0xff]  }
  0x5d   :  { %1296 = vmatpush1.bf16.msra.mxu0 %v2354_v38  ;;  %1460 = vmatpush1.bf16.msra.mxu1 %v2355_v39  ;;  %v2442_v38 = vld [vmem:[#allocation5 + $0x304] ss:$16 sps:$4 sm:$0xff]   ;;  %v2445_v39 = vld [vmem:[#allocation5 + $0x30c] ss:$16 sps:$4 sm:$0xff]  }
  0x5e   :  { %1297 = vmatprep.subr.bf16.mxu0 %v2356_v40  ;;  %1461 = vmatprep.subr.bf16.mxu1 %v2358_v41  ;;  %v2440_v40 = vld [vmem:[#allocation5 + $0x300] ss:$16 sps:$4 sm:$0xff]   ;;  %v2443_v41 = vld [vmem:[#allocation5 + $0x308] ss:$16 sps:$4 sm:$0xff]  }
  0x61   :  { %1298 = vmatpush1.bf16.msra.mxu0 %v2360_v42  ;;  %1462 = vmatpush1.bf16.msra.mxu1 %v2361_v43  ;;  %v2448_v42 = vld [vmem:[#allocation5 + $0x324] ss:$16 sps:$4 sm:$0xff]   ;;  %v2451_v43 = vld [vmem:[#allocation5 + $0x32c] ss:$16 sps:$4 sm:$0xff]  }
  0x62   :  { %1299 = vmatprep.subr.bf16.mxu0 %v2362_v44  ;;  %1463 = vmatprep.subr.bf16.mxu1 %v2364_v45  ;;  %v2446_v44 = vld [vmem:[#allocation5 + $0x320] ss:$16 sps:$4 sm:$0xff]   ;;  %v2449_v45 = vld [vmem:[#allocation5 + $0x328] ss:$16 sps:$4 sm:$0xff]  }
  0x65   :  { %1300 = vmatpush1.bf16.msra.mxu0 %v2366_v47  ;;  %1464 = vmatpush1.bf16.msra.mxu1 %v2367_v49  ;;  %v2457_v47 = vld [vmem:[#allocation5 + $0x34c] ss:$16 sps:$4 sm:$0xff]   ;;  %v2455_v49 = vld [vmem:[#allocation5 + $0x348] ss:$16 sps:$4 sm:$0xff]  }
  0x66   :  { %1301 = vmatprep.subr.bf16.mxu0 %v2368_v50  ;;  %1465 = vmatprep.subr.bf16.mxu1 %v2370_v51  ;;  %v2460_v50 = vld [vmem:[#allocation5 + $0x364] ss:$16 sps:$4 sm:$0xff]   ;;  %v2463_v51 = vld [vmem:[#allocation5 + $0x36c] ss:$16 sps:$4 sm:$0xff]  }
  0x69   :  { %1302 = vmatpush1.bf16.msra.mxu0 %v2372_v52  ;;  %1466 = vmatpush1.bf16.msra.mxu1 %v2373_v53  ;;  %v2458_v52 = vld [vmem:[#allocation5 + $0x360] ss:$16 sps:$4 sm:$0xff]   ;;  %v2461_v53 = vld [vmem:[#allocation5 + $0x368] ss:$16 sps:$4 sm:$0xff]  }
  0x6a   :  { %1303 = vmatprep.subr.bf16.mxu0 %v2374_v54  ;;  %1467 = vmatprep.subr.bf16.mxu1 %v2376_v55  ;;  %v2466_v54 = vld [vmem:[#allocation5 + $0x384] ss:$16 sps:$4 sm:$0xff]   ;;  %v2469_v55 = vld [vmem:[#allocation5 + $0x38c] ss:$16 sps:$4 sm:$0xff]  }
  0x6d   :  { %1304 = vmatpush1.bf16.msra.mxu0 %v2378_v56  ;;  %1468 = vmatpush1.bf16.msra.mxu1 %v2379_v57  ;;  %v2464_v56 = vld [vmem:[#allocation5 + $0x380] ss:$16 sps:$4 sm:$0xff]   ;;  %v2467_v57 = vld [vmem:[#allocation5 + $0x388] ss:$16 sps:$4 sm:$0xff]  }
  0x6e   :  { %1305 = vmatprep.subr.bf16.mxu0 %v2380_v58  ;;  %1469 = vmatprep.subr.bf16.mxu1 %v2382_v59  ;;  %v2472_v58 = vld [vmem:[#allocation5 + $0x3a4] ss:$16 sps:$4 sm:$0xff]   ;;  %v2475_v59 = vld [vmem:[#allocation5 + $0x3ac] ss:$16 sps:$4 sm:$0xff]  }
  0x71   :  { %1306 = vmatpush1.bf16.msra.mxu0 %v2384_v60  ;;  %1470 = vmatpush1.bf16.msra.mxu1 %v2385_v61  ;;  %v2470_v60 = vld [vmem:[#allocation5 + $0x3a0] ss:$16 sps:$4 sm:$0xff]   ;;  %v2473_v61 = vld [vmem:[#allocation5 + $0x3a8] ss:$16 sps:$4 sm:$0xff]  }
  0x72   :  { %1307 = vmatprep.subr.bf16.mxu0 %v2386_v62  ;;  %1471 = vmatprep.subr.bf16.mxu1 %v2388_v63  ;;  %v2478_v62 = vld [vmem:[#allocation5 + $0x3c4] ss:$16 sps:$4 sm:$0xff]   ;;  %v2481_v63 = vld [vmem:[#allocation5 + $0x3cc] ss:$16 sps:$4 sm:$0xff]  }
  0x75   :  { %1308 = vmatpush1.bf16.msra.mxu0 %v2390_v0  ;;  %1472 = vmatpush1.bf16.msra.mxu1 %v2391_v1  ;;  %v2476_v0 = vld [vmem:[#allocation5 + $0x3c0] ss:$16 sps:$4 sm:$0xff]   ;;  %v2479_v1 = vld [vmem:[#allocation5 + $0x3c8] ss:$16 sps:$4 sm:$0xff]  }
  0x76   :  { %1318 = vmatprep.subr.bf16.mxu0 %v2394_v3  ;;  %1482 = vmatprep.subr.bf16.mxu1 %v2397_v4  ;;  %v2487_v3 = vld [vmem:[#allocation5 + $0x3ec] ss:$16 sps:$4 sm:$0xff]   ;;  %v2482_v4 = vld [vmem:[#allocation5 + $0x3e0] ss:$16 sps:$4 sm:$0xff]  }
  0x78   :  { %1310 = vmatmul.mubr.bf16.vlgmr.msra.gmra.mrb[0].mxu0 %v68_v5  ;;  %1474 = vmatmul.mubr.bf16.vlgmr.msra.gmra.mrb[0].mxu1 %v68_v5  ;;  %v2485_v5 = vld [vmem:[#allocation5 + $0x3e8] ss:$16 sps:$4 sm:$0xff]  }
  0x79   :  { %1319 = vmatpush1.bf16.msra.mxu0 %v2392_v6  ;;  %1483 = vmatpush1.bf16.msra.mxu1 %v2395_v7  ;;  %v2490_v6 = vld [vmem:[#allocation5 + $0x404] ss:$16 sps:$4 sm:$0xff]   ;;  %v63_v7 = vld [vmem:[#allocation2 + $0x10] sm:$0xff] }
  0x7a   :  { %1320 = vmatprep.subr.bf16.mxu0 %v2400_v8  ;;  %1484 = vmatprep.subr.bf16.mxu1 %v2403_v9  ;;  %v2493_v8 = vld [vmem:[#allocation5 + $0x40c] ss:$16 sps:$4 sm:$0xff]   ;;  %v2488_v9 = vld [vmem:[#allocation5 + $0x400] ss:$16 sps:$4 sm:$0xff]  }
  0x7b   :  { %1350 = vmatprep.mubr.bf16.mxu0 %v71_v32  ;;  %1514 = vmatprep.mubr.bf16.mxu1 %v71_v32  ;;  %v2518_v32 = vld [vmem:[#allocation5 + $0x4a0] ss:$16 sps:$4 sm:$0xff]  }
  0x7d   :  { %1321 = vmatpush1.bf16.msra.mxu0 %v2398_v10  ;;  %1485 = vmatpush1.bf16.msra.mxu1 %v2401_v11  ;;  %v70_v10 = vpack.c.bf16 %v63_v7, %v63_v7  ;;  %v2491_v11 = vld [vmem:[#allocation5 + $0x408] ss:$16 sps:$4 sm:$0xff]   ;;  %v2583_v7 = vld [vmem:[#allocation5 + $0x5ec] ss:$16 sps:$4 sm:$0xff]  }
  0x7e   :  { %1322 = vmatprep.subr.bf16.mxu0 %v2406_v12  ;;  %1486 = vmatprep.subr.bf16.mxu1 %v2409_v13  ;;  %v2496_v12 = vld [vmem:[#allocation5 + $0x424] ss:$16 sps:$4 sm:$0xff]   ;;  %v2499_v13 = vld [vmem:[#allocation5 + $0x42c] ss:$16 sps:$4 sm:$0xff]  }
  0x81   :  { %1323 = vmatpush1.bf16.msra.mxu0 %v2404_v14  ;;  %1487 = vmatpush1.bf16.msra.mxu1 %v2407_v15  ;;  %v66_v14 = vld [vmem:[#allocation2 + $0x28] sm:$0xff] }
  0x82   :  { %1324 = vmatprep.subr.bf16.mxu0 %v2412_v16  ;;  %1488 = vmatprep.subr.bf16.mxu1 %v2415_v17  ;;  %v73_v15 = vpack.c.bf16 %v66_v14, %v66_v14  ;;  %v2494_v16 = vld [vmem:[#allocation5 + $0x420] ss:$16 sps:$4 sm:$0xff]   ;;  %v2497_v17 = vld [vmem:[#allocation5 + $0x428] ss:$16 sps:$4 sm:$0xff]  }
  0x83   :  { %v2584_v14 = vld [vmem:[#allocation5 + $0x600] ss:$16 sps:$4 sm:$0xff]  }
  0x85   :  { %1325 = vmatpush1.bf16.msra.mxu0 %v2410_v18  ;;  %1489 = vmatpush1.bf16.msra.mxu1 %v2413_v19  ;;  %v2502_v18 = vld [vmem:[#allocation5 + $0x444] ss:$16 sps:$4 sm:$0xff]   ;;  %v2505_v19 = vld [vmem:[#allocation5 + $0x44c] ss:$16 sps:$4 sm:$0xff]  }
  0x86   :  { %1326 = vmatprep.subr.bf16.mxu0 %v2418_v20  ;;  %1490 = vmatprep.subr.bf16.mxu1 %v2421_v21  ;;  %v2500_v20 = vld [vmem:[#allocation5 + $0x440] ss:$16 sps:$4 sm:$0xff]   ;;  %v2503_v21 = vld [vmem:[#allocation5 + $0x448] ss:$16 sps:$4 sm:$0xff]  }
  0x89   :  { %1327 = vmatpush1.bf16.msra.mxu0 %v2416_v22  ;;  %1491 = vmatpush1.bf16.msra.mxu1 %v2419_v23  ;;  %v2508_v22 = vld [vmem:[#allocation5 + $0x464] ss:$16 sps:$4 sm:$0xff]   ;;  %v2511_v23 = vld [vmem:[#allocation5 + $0x46c] ss:$16 sps:$4 sm:$0xff]  }
  0x8a   :  { %1328 = vmatprep.subr.bf16.mxu0 %v2424_v24  ;;  %1492 = vmatprep.subr.bf16.mxu1 %v2427_v25  ;;  %v2506_v24 = vld [vmem:[#allocation5 + $0x460] ss:$16 sps:$4 sm:$0xff]   ;;  %v2509_v25 = vld [vmem:[#allocation5 + $0x468] ss:$16 sps:$4 sm:$0xff]  }
  0x8d   :  { %1329 = vmatpush1.bf16.msra.mxu0 %v2422_v26  ;;  %1493 = vmatpush1.bf16.msra.mxu1 %v2425_v27  ;;  %v2514_v26 = vld [vmem:[#allocation5 + $0x484] ss:$16 sps:$4 sm:$0xff]   ;;  %v2517_v27 = vld [vmem:[#allocation5 + $0x48c] ss:$16 sps:$4 sm:$0xff]  }
  0x8e   :  { %1330 = vmatprep.subr.bf16.mxu0 %v2430_v28  ;;  %1494 = vmatprep.subr.bf16.mxu1 %v2433_v29  ;;  %v2512_v28 = vld [vmem:[#allocation5 + $0x480] ss:$16 sps:$4 sm:$0xff]   ;;  %v2515_v29 = vld [vmem:[#allocation5 + $0x488] ss:$16 sps:$4 sm:$0xff]  }
  0x91   :  { %1331 = vmatpush1.bf16.msra.mxu0 %v2428_v31  ;;  %1495 = vmatpush1.bf16.msra.mxu1 %v2431_v33  ;;  %v2523_v31 = vld [vmem:[#allocation5 + $0x4ac] ss:$16 sps:$4 sm:$0xff]   ;;  %v2521_v33 = vld [vmem:[#allocation5 + $0x4a8] ss:$16 sps:$4 sm:$0xff]  }
  0x92   :  { %1332 = vmatprep.subr.bf16.mxu0 %v2436_v34  ;;  %1496 = vmatprep.subr.bf16.mxu1 %v2439_v35  ;;  %v2526_v34 = vld [vmem:[#allocation5 + $0x4c4] ss:$16 sps:$4 sm:$0xff]   ;;  %v2529_v35 = vld [vmem:[#allocation5 + $0x4cc] ss:$16 sps:$4 sm:$0xff]  }
  0x95   :  { %1333 = vmatpush1.bf16.msra.mxu0 %v2434_v36  ;;  %1497 = vmatpush1.bf16.msra.mxu1 %v2437_v37  ;;  %v2524_v36 = vld [vmem:[#allocation5 + $0x4c0] ss:$16 sps:$4 sm:$0xff]   ;;  %v2527_v37 = vld [vmem:[#allocation5 + $0x4c8] ss:$16 sps:$4 sm:$0xff]  }
  0x96   :  { %1334 = vmatprep.subr.bf16.mxu0 %v2442_v38  ;;  %1498 = vmatprep.subr.bf16.mxu1 %v2445_v39  ;;  %v2532_v38 = vld [vmem:[#allocation5 + $0x4e4] ss:$16 sps:$4 sm:$0xff]   ;;  %v2535_v39 = vld [vmem:[#allocation5 + $0x4ec] ss:$16 sps:$4 sm:$0xff]  }
  0x99   :  { %1335 = vmatpush1.bf16.msra.mxu0 %v2440_v40  ;;  %1499 = vmatpush1.bf16.msra.mxu1 %v2443_v41  ;;  %v2530_v40 = vld [vmem:[#allocation5 + $0x4e0] ss:$16 sps:$4 sm:$0xff]   ;;  %v2533_v41 = vld [vmem:[#allocation5 + $0x4e8] ss:$16 sps:$4 sm:$0xff]  }
  0x9a   :  { %1336 = vmatprep.subr.bf16.mxu0 %v2448_v42  ;;  %1500 = vmatprep.subr.bf16.mxu1 %v2451_v43  ;;  %v2538_v42 = vld [vmem:[#allocation5 + $0x504] ss:$16 sps:$4 sm:$0xff]   ;;  %v2541_v43 = vld [vmem:[#allocation5 + $0x50c] ss:$16 sps:$4 sm:$0xff]  }
  0x9d   :  { %1337 = vmatpush1.bf16.msra.mxu0 %v2446_v44  ;;  %1501 = vmatpush1.bf16.msra.mxu1 %v2449_v45  ;;  %v2536_v44 = vld [vmem:[#allocation5 + $0x500] ss:$16 sps:$4 sm:$0xff]   ;;  %v2539_v45 = vld [vmem:[#allocation5 + $0x508] ss:$16 sps:$4 sm:$0xff]  }
  0x9e   :  { %1338 = vmatprep.subr.bf16.mxu0 %v2454_v46  ;;  %1502 = vmatprep.subr.bf16.mxu1 %v2457_v47  ;;  %v2544_v46 = vld [vmem:[#allocation5 + $0x524] ss:$16 sps:$4 sm:$0xff]   ;;  %v2547_v47 = vld [vmem:[#allocation5 + $0x52c] ss:$16 sps:$4 sm:$0xff]  }
  0xa1   :  { %1339 = vmatpush1.bf16.msra.mxu0 %v2452_v48  ;;  %1503 = vmatpush1.bf16.msra.mxu1 %v2455_v49  ;;  %v2542_v48 = vld [vmem:[#allocation5 + $0x520] ss:$16 sps:$4 sm:$0xff]   ;;  %v2545_v49 = vld [vmem:[#allocation5 + $0x528] ss:$16 sps:$4 sm:$0xff]  }
  0xa2   :  { %1340 = vmatprep.subr.bf16.mxu0 %v2460_v50  ;;  %1504 = vmatprep.subr.bf16.mxu1 %v2463_v51  ;;  %v2550_v50 = vld [vmem:[#allocation5 + $0x544] ss:$16 sps:$4 sm:$0xff]   ;;  %v2553_v51 = vld [vmem:[#allocation5 + $0x54c] ss:$16 sps:$4 sm:$0xff]  }
  0xa5   :  { %1341 = vmatpush1.bf16.msra.mxu0 %v2458_v52  ;;  %1505 = vmatpush1.bf16.msra.mxu1 %v2461_v53  ;;  %v2548_v52 = vld [vmem:[#allocation5 + $0x540] ss:$16 sps:$4 sm:$0xff]   ;;  %v2551_v53 = vld [vmem:[#allocation5 + $0x548] ss:$16 sps:$4 sm:$0xff]  }
  0xa6   :  { %1342 = vmatprep.subr.bf16.mxu0 %v2466_v54  ;;  %1506 = vmatprep.subr.bf16.mxu1 %v2469_v55  ;;  %v2556_v54 = vld [vmem:[#allocation5 + $0x564] ss:$16 sps:$4 sm:$0xff]   ;;  %v2559_v55 = vld [vmem:[#allocation5 + $0x56c] ss:$16 sps:$4 sm:$0xff]  }
  0xa9   :  { %1343 = vmatpush1.bf16.msra.mxu0 %v2464_v56  ;;  %1507 = vmatpush1.bf16.msra.mxu1 %v2467_v57  ;;  %v2554_v56 = vld [vmem:[#allocation5 + $0x560] ss:$16 sps:$4 sm:$0xff]   ;;  %v2557_v57 = vld [vmem:[#allocation5 + $0x568] ss:$16 sps:$4 sm:$0xff]  }
  0xaa   :  { %1344 = vmatprep.subr.bf16.mxu0 %v2472_v58  ;;  %1508 = vmatprep.subr.bf16.mxu1 %v2475_v59  ;;  %v2562_v58 = vld [vmem:[#allocation5 + $0x584] ss:$16 sps:$4 sm:$0xff]   ;;  %v2565_v59 = vld [vmem:[#allocation5 + $0x58c] ss:$16 sps:$4 sm:$0xff]  }
  0xad   :  { %1345 = vmatpush1.bf16.msra.mxu0 %v2470_v60  ;;  %1509 = vmatpush1.bf16.msra.mxu1 %v2473_v61  ;;  %v2560_v60 = vld [vmem:[#allocation5 + $0x580] ss:$16 sps:$4 sm:$0xff]   ;;  %v2563_v61 = vld [vmem:[#allocation5 + $0x588] ss:$16 sps:$4 sm:$0xff]  }
  0xae   :  { %1346 = vmatprep.subr.bf16.mxu0 %v2478_v62  ;;  %1510 = vmatprep.subr.bf16.mxu1 %v2481_v63  ;;  %v2568_v62 = vld [vmem:[#allocation5 + $0x5a4] ss:$16 sps:$4 sm:$0xff]   ;;  %v2571_v63 = vld [vmem:[#allocation5 + $0x5ac] ss:$16 sps:$4 sm:$0xff]  }
  0xb1   :  { %1347 = vmatpush1.bf16.msra.mxu0 %v2476_v0  ;;  %1511 = vmatpush1.bf16.msra.mxu1 %v2479_v1  ;;  %v2566_v0 = vld [vmem:[#allocation5 + $0x5a0] ss:$16 sps:$4 sm:$0xff]   ;;  %v2569_v1 = vld [vmem:[#allocation5 + $0x5a8] ss:$16 sps:$4 sm:$0xff]  }
  0xb2   :  { %1348 = vmatprep.subr.bf16.mxu0 %v2484_v2  ;;  %1512 = vmatprep.subr.bf16.mxu1 %v2487_v3  ;;  %v2574_v2 = vld [vmem:[#allocation5 + $0x5c4] ss:$16 sps:$4 sm:$0xff]   ;;  %v2577_v3 = vld [vmem:[#allocation5 + $0x5cc] ss:$16 sps:$4 sm:$0xff]  }
  0xb5   :  { %1349 = vmatpush1.bf16.msra.mxu0 %v2482_v4  ;;  %1513 = vmatpush1.bf16.msra.mxu1 %v2485_v5  ;;  %v2572_v4 = vld [vmem:[#allocation5 + $0x5c0] ss:$16 sps:$4 sm:$0xff]   ;;  %v2575_v5 = vld [vmem:[#allocation5 + $0x5c8] ss:$16 sps:$4 sm:$0xff]  }
  0xb6   :  { %1359 = vmatprep.subr.bf16.mxu0 %v2490_v6  ;;  %1523 = vmatprep.subr.bf16.mxu1 %v2493_v8  ;;  %v2580_v6 = vld [vmem:[#allocation5 + $0x5e4] ss:$16 sps:$4 sm:$0xff]   ;;  %v2578_v8 = vld [vmem:[#allocation5 + $0x5e0] ss:$16 sps:$4 sm:$0xff]  }
  0xb8   :  { %1351 = vmatmul.mubr.bf16.vlgmr.msra.gmra.mrb[0].mxu0 %v70_v10  ;;  %1515 = vmatmul.mubr.bf16.vlgmr.msra.gmra.mrb[0].mxu1 %v70_v10  ;;  %v65_v10 = vld [vmem:[#allocation2 + $0x20] sm:$0xff] }
  0xb9   :  { %1360 = vmatpush1.bf16.msra.mxu0 %v2488_v9  ;;  %1524 = vmatpush1.bf16.msra.mxu1 %v2491_v11  ;;  %v2581_v9 = vld [vmem:[#allocation5 + $0x5e8] ss:$16 sps:$4 sm:$0xff]   ;;  %v2586_v11 = vld [vmem:[#allocation5 + $0x604] ss:$16 sps:$4 sm:$0xff]  }
  0xba   :  { %1361 = vmatprep.subr.bf16.mxu0 %v2496_v12  ;;  %1525 = vmatprep.subr.bf16.mxu1 %v2499_v13  ;;  %v2589_v12 = vld [vmem:[#allocation5 + $0x60c] ss:$16 sps:$4 sm:$0xff]   ;;  %v72_v13 = vpack.c.bf16 %v65_v10, %v65_v10 }
  0xbb   :  { %1391 = vmatprep.mubr.bf16.mxu0 %v73_v15  ;;  %1555 = vmatprep.mubr.bf16.mxu1 %v73_v15  ;;  %v2587_v15 = vld [vmem:[#allocation5 + $0x608] ss:$16 sps:$4 sm:$0xff]  }
  0xbd   :  { %1362 = vmatpush1.bf16.msra.mxu0 %v2494_v16  ;;  %1526 = vmatpush1.bf16.msra.mxu1 %v2497_v17  ;;  %v2590_v16 = vld [vmem:[#allocation7 + $0x40] sm:$0xff]  }
  0xbe   :  { %1363 = vmatprep.subr.bf16.mxu0 %v2502_v18  ;;  %1527 = vmatprep.subr.bf16.mxu1 %v2505_v19  ;;  %v2591_v17 = vld [vmem:[#allocation7 + $0xc0] sm:$0xff]   ;;  %v2727_v18 = vmov 0   ;;  %v67_v19 = vld [vmem:[#allocation2 + $0x30] sm:$0xff] }
  0xc1   :  { %1364 = vmatpush1.bf16.msra.mxu0 %v2500_v20  ;;  %1528 = vmatpush1.bf16.msra.mxu1 %v2503_v21  ;;  %v74_v20 = vpack.c.bf16 %v67_v19, %v67_v19  ;;  %v2592_v21 = vld [vmem:[#allocation7] sm:$0xff]  }
  0xc2   :  { %1365 = vmatprep.subr.bf16.mxu0 %v2508_v22  ;;  %1529 = vmatprep.subr.bf16.mxu1 %v2511_v23  ;;  %v2593_v22 = vld [vmem:[#allocation7 + $0x80] sm:$0xff]   ;;  %v2594_v23 = vld [vmem:[#allocation7 + $0x48] sm:$0xff]  }
  0xc5   :  { %1366 = vmatpush1.bf16.msra.mxu0 %v2506_v24  ;;  %1530 = vmatpush1.bf16.msra.mxu1 %v2509_v25  ;;  %v2595_v24 = vld [vmem:[#allocation7 + $0xc8] sm:$0xff]  }
  0xc6   :  { %1367 = vmatprep.subr.bf16.mxu0 %v2514_v26  ;;  %1531 = vmatprep.subr.bf16.mxu1 %v2517_v27  ;;  %v2596_v25 = vld [vmem:[#allocation7 + $0x8] sm:$0xff]   ;;  %v2598_v27 = vld [vmem:[#allocation7 + $0x50] sm:$0xff]  }
  0xc7   :  { %v2597_v26 = vld [vmem:[#allocation7 + $0x88] sm:$0xff]  }
  0xc9   :  { %1368 = vmatpush1.bf16.msra.mxu0 %v2512_v28  ;;  %1532 = vmatpush1.bf16.msra.mxu1 %v2515_v29  ;;  %v2599_v28 = vld [vmem:[#allocation7 + $0xd0] sm:$0xff]  }
  0xca   :  { %1369 = vmatprep.subr.bf16.mxu0 %v2520_v30  ;;  %1533 = vmatprep.subr.bf16.mxu1 %v2523_v31  ;;  %v2600_v29 = vld [vmem:[#allocation7 + $0x10] sm:$0xff]   ;;  %v2602_v31 = vld [vmem:[#allocation7 + $0x58] sm:$0xff]  }
  0xcb   :  { %v2601_v30 = vld [vmem:[#allocation7 + $0x90] sm:$0xff]  }
  0xcd   :  { %1370 = vmatpush1.bf16.msra.mxu0 %v2518_v32  ;;  %1534 = vmatpush1.bf16.msra.mxu1 %v2521_v33  ;;  %v2603_v32 = vld [vmem:[#allocation7 + $0xd8] sm:$0xff]  }
  0xce   :  { %1371 = vmatprep.subr.bf16.mxu0 %v2526_v34  ;;  %1535 = vmatprep.subr.bf16.mxu1 %v2529_v35  ;;  %v2604_v33 = vld [vmem:[#allocation7 + $0x18] sm:$0xff]   ;;  %v2606_v35 = vld [vmem:[#allocation7 + $0x60] sm:$0xff]  }
  0xcf   :  { %v2605_v34 = vld [vmem:[#allocation7 + $0x98] sm:$0xff]  }
  0xd1   :  { %1372 = vmatpush1.bf16.msra.mxu0 %v2524_v36  ;;  %1536 = vmatpush1.bf16.msra.mxu1 %v2527_v37  ;;  %v2607_v36 = vld [vmem:[#allocation7 + $0xe0] sm:$0xff]  }
  0xd2   :  { %1373 = vmatprep.subr.bf16.mxu0 %v2532_v38  ;;  %1537 = vmatprep.subr.bf16.mxu1 %v2535_v39  ;;  %v2608_v37 = vld [vmem:[#allocation7 + $0x20] sm:$0xff]   ;;  %v2610_v39 = vld [vmem:[#allocation7 + $0x68] sm:$0xff]  }
  0xd3   :  { %v2609_v38 = vld [vmem:[#allocation7 + $0xa0] sm:$0xff]  }
  0xd5   :  { %1374 = vmatpush1.bf16.msra.mxu0 %v2530_v40  ;;  %1538 = vmatpush1.bf16.msra.mxu1 %v2533_v41  ;;  %v2611_v40 = vld [vmem:[#allocation7 + $0xe8] sm:$0xff]  }
  0xd6   :  { %1375 = vmatprep.subr.bf16.mxu0 %v2538_v42  ;;  %1539 = vmatprep.subr.bf16.mxu1 %v2541_v43  ;;  %v2612_v41 = vld [vmem:[#allocation7 + $0x28] sm:$0xff]   ;;  %v2614_v43 = vld [vmem:[#allocation7 + $0x70] sm:$0xff]  }
  0xd7   :  { %v2613_v42 = vld [vmem:[#allocation7 + $0xa8] sm:$0xff]  }
  0xd9   :  { %1376 = vmatpush1.bf16.msra.mxu0 %v2536_v44  ;;  %1540 = vmatpush1.bf16.msra.mxu1 %v2539_v45  ;;  %v2615_v44 = vld [vmem:[#allocation7 + $0xf0] sm:$0xff]  }
  0xda   :  { %1377 = vmatprep.subr.bf16.mxu0 %v2544_v46  ;;  %1541 = vmatprep.subr.bf16.mxu1 %v2547_v47  ;;  %v2616_v45 = vld [vmem:[#allocation7 + $0x30] sm:$0xff]   ;;  %v2618_v47 = vld [vmem:[#allocation7 + $0x78] sm:$0xff]  }
  0xdb   :  { %v2617_v46 = vld [vmem:[#allocation7 + $0xb0] sm:$0xff]  }
  0xdd   :  { %1378 = vmatpush1.bf16.msra.mxu0 %v2542_v48  ;;  %1542 = vmatpush1.bf16.msra.mxu1 %v2545_v49  ;;  %v2619_v48 = vld [vmem:[#allocation7 + $0xf8] sm:$0xff]  }
  0xde   :  { %1379 = vmatprep.subr.bf16.mxu0 %v2550_v50  ;;  %1543 = vmatprep.subr.bf16.mxu1 %v2553_v51  ;;  %v2620_v49 = vld [vmem:[#allocation7 + $0x38] sm:$0xff]   ;;  %v273_v51 = vlaneseq }
  0xdf   :  { %v2621_v50 = vld [vmem:[#allocation7 + $0xb8] sm:$0xff]  }
  0xe1   :  { %1380 = vmatpush1.bf16.msra.mxu0 %v2548_v52  ;;  %1544 = vmatpush1.bf16.msra.mxu1 %v2551_v53  ;;  %v274_v52 = vshrl.u32 %v273_v51, 7 }
  0xe2   :  { %1381 = vmatprep.subr.bf16.mxu0 %v2556_v54  ;;  %1545 = vmatprep.subr.bf16.mxu1 %v2559_v55  ;;  %v271_v55 = vld [vmem:[%s2815_s2] sm:$0xf] }
  0xe3   :  { %v275_v53 = vsub.s32 0, %v274_v52  ;;  %v283_v54 = vsub.s32 2, %v274_v52 }
  0xe5   :  { %1382 = vmatpush1.bf16.msra.mxu0 %v2554_v56  ;;  %1546 = vmatpush1.bf16.msra.mxu1 %v2557_v57  ;;  %v279_v56 = vsub.s32 1, %v274_v52  ;;  %v287_v57 = vsub.s32 3, %v274_v52 }
  0xe6   :  { %1383 = vmatprep.subr.bf16.mxu0 %v2562_v58  ;;  %1547 = vmatprep.subr.bf16.mxu1 %v2565_v59  ;;  %v276_v58 = vrot.slane %v271_v55, %v275_v53  ;;  %v284_v59 = vrot.slane %v271_v55, %v283_v54 }
  0xe9   :  { %1384 = vmatpush1.bf16.msra.mxu0 %v2560_v60  ;;  %1548 = vmatpush1.bf16.msra.mxu1 %v2563_v61  ;;  %v280_v60 = vrot.slane %v271_v55, %v279_v56  ;;  %v288_v61 = vrot.slane %v271_v55, %v287_v57 }
  0xea   :  { %1385 = vmatprep.subr.bf16.mxu0 %v2568_v62  ;;  %1549 = vmatprep.subr.bf16.mxu1 %v2571_v63 }
  0xed   :  { %1386 = vmatpush1.bf16.msra.mxu0 %v2566_v0  ;;  %1550 = vmatpush1.bf16.msra.mxu1 %v2569_v1 }
  0xee   :  { %1387 = vmatprep.subr.bf16.mxu0 %v2574_v2  ;;  %1551 = vmatprep.subr.bf16.mxu1 %v2577_v3 }
  0xf1   :  { %1388 = vmatpush1.bf16.msra.mxu0 %v2572_v4  ;;  %1552 = vmatpush1.bf16.msra.mxu1 %v2575_v5 }
  0xf2   :  { %1389 = vmatprep.subr.bf16.mxu0 %v2580_v6  ;;  %1553 = vmatprep.subr.bf16.mxu1 %v2583_v7 }
  0xf5   :  { %1390 = vmatpush1.bf16.msra.mxu0 %v2578_v8  ;;  %1554 = vmatpush1.bf16.msra.mxu1 %v2581_v9 }
  0xf6   :  { %1400 = vmatprep.subr.bf16.mxu0 %v2586_v11  ;;  %1564 = vmatprep.subr.bf16.mxu1 %v2589_v12 }
  0xf8   :  { %1392 = vmatmul.mubr.bf16.vlgmr.msra.gmra.mrb[0].mxu0 %v72_v13  ;;  %1556 = vmatmul.mubr.bf16.vlgmr.msra.gmra.mrb[0].mxu1 %v72_v13 }
  0xf9   :  { %1401 = vmatpush1.bf16.msra.mxu0 %v2584_v14  ;;  %1565 = vmatpush1.bf16.msra.mxu1 %v2587_v15 }
  0xfa   :  { %1432 = vmatprep.mubr.bf16.mxu0 %v2727_v18  ;;  %1596 = vmatprep.mubr.bf16.mxu1 %v2727_v18 }
  0xfb   :  { %2215 = vmatprep.subr.bf16.mxu0 %v2590_v16  ;;  %2237 = vmatprep.subr.bf16.mxu1 %v2591_v17 }
 0x104   :  { %2180 = vmatmul.mubr.msk.bf16.vlgmr.msra.gmra.mrb[0].mxu0 %vm1273_vm0, %v74_v20  ;;  %2181 = vmatmul.mubr.msk.bf16.vlgmr.msra.gmra.mrb[0].mxu1 %vm1273_vm0, %v74_v20  ;;  %v2182_v20 = vld [vmem:[%s2817_s4] ss:$0 sm:$0xff]  ;;  %s2728_s4 = smov [#allocation8]  }
 0x105   :  { %2216 = vmatpush3.bf16.msra.mxu0 %v2592_v21  ;;  %2238 = vmatpush3.bf16.msra.mxu1 %v2593_v22  ;;  %s1974_s8 = sshll.u32 %s2728_s4, 4  ;;  %s1975_s8 = int_to_ptr.vmem [resolvable:$true] %s1974_s8 }
 0x106   :  { %2217 = vmatprep.subr.bf16.mxu0 %v2594_v23  ;;  %2239 = vmatprep.subr.bf16.mxu1 %v2595_v24  ;;  %s2692_s9 = scalar_lea.vmem %s1975_s8, 64  ;;  %p2697_p11 = scmp.lt.s32.totalorder %s1975_s8, %s1975_s8 }
 0x107   :  { %p2693_p10 = scmp.ne.s32.totalorder %s1975_s8, %s2692_s9  ;;  %p2698_p12 = scmp.lt.s32.totalorder %s2692_s9, %s2692_s9 }
 0x109   :  { %2218 = vmatpush3.bf16.msra.mxu0 %v2596_v25  ;;  %2240 = vmatpush3.bf16.msra.mxu1 %v2597_v26  ;;  %p2699_p13 = por %p2698_p12, %p2697_p11 }
 0x10a   :  { %2219 = vmatprep.subr.bf16.mxu0 %v2598_v27  ;;  %2241 = vmatprep.subr.bf16.mxu1 %v2599_v28 }
 0x10b   :  { %p2700_p0 = pnand %p2699_p13, %p2693_p10 }
 0x10d   :  { %2220 = vmatpush3.bf16.msra.mxu0 %v2600_v29  ;;  %2242 = vmatpush3.bf16.msra.mxu1 %v2601_v30 }
 0x10e   :  { %2221 = vmatprep.subr.bf16.mxu0 %v2602_v31  ;;  %2243 = vmatprep.subr.bf16.mxu1 %v2603_v32 }
 0x111   :  { %2222 = vmatpush3.bf16.msra.mxu0 %v2604_v33  ;;  %2244 = vmatpush3.bf16.msra.mxu1 %v2605_v34 }
 0x112   :  { %2223 = vmatprep.subr.bf16.mxu0 %v2606_v35  ;;  %2245 = vmatprep.subr.bf16.mxu1 %v2607_v36 }
 0x115   :  { %2224 = vmatpush3.bf16.msra.mxu0 %v2608_v37  ;;  %2246 = vmatpush3.bf16.msra.mxu1 %v2609_v38 }
 0x116   :  { %2225 = vmatprep.subr.bf16.mxu0 %v2610_v39  ;;  %2247 = vmatprep.subr.bf16.mxu1 %v2611_v40 }
 0x119   :  { %2226 = vmatpush3.bf16.msra.mxu0 %v2612_v41  ;;  %2248 = vmatpush3.bf16.msra.mxu1 %v2613_v42 }
 0x11a   :  { %2227 = vmatprep.subr.bf16.mxu0 %v2614_v43  ;;  %2249 = vmatprep.subr.bf16.mxu1 %v2615_v44 }
 0x11d   :  { %2228 = vmatpush3.bf16.msra.mxu0 %v2616_v45  ;;  %2250 = vmatpush3.bf16.msra.mxu1 %v2617_v46 }
 0x11e   :  { %2229 = vmatprep.subr.bf16.mxu0 %v2618_v47  ;;  %2251 = vmatprep.subr.bf16.mxu1 %v2619_v48 }
 0x121   :  { %2230 = vmatpush3.bf16.msra.mxu0 %v2620_v49  ;;  %2252 = vmatpush3.bf16.msra.mxu1 %v2621_v50 }
 0x1d7   :  { %v1434_v62 = vpop.f32.mrb[0].mxu0  ;;  %v1598_v63 = vpop.f32.mrb[0].mxu1 }
 0x1d8   :  { %v2259_v0 = vadd.f32 %v1434_v62, %v276_v58  ;;  %v2261_v1 = vadd.f32 %v1598_v63, %v284_v59  ;;  %v1436_v2 = vpop.f32.mrb[1].mxu0  ;;  %v1600_v3 = vpop.f32.mrb[1].mxu1 }
 0x1d9   :  { %v2260_v4 = vadd.f32 %v1436_v2, %v280_v60  ;;  %v2262_v5 = vadd.f32 %v1600_v3, %v288_v61  ;;  %v1438_v6 = vpop.f32.mrb[2].mxu0  ;;  %v1602_v7 = vpop.f32.mrb[2].mxu1 }
 0x1da   :  { %v1605_v8 = vmax.f32 %v2259_v0, 0.0  ;;  %v1607_v9 = vmax.f32 %v2261_v1, 0.0  ;;  %v1439_v10 = vpop.f32.mrb[3].mxu0  ;;  %v1603_v11 = vpop.f32.mrb[3].mxu1 }
 0x1db   :  { %v1606_v12 = vmax.f32 %v2260_v4, 0.0  ;;  %v1608_v13 = vmax.f32 %v2262_v5, 0.0 }
 0x1dc   :  { %v1609_v16 = vpack.c.bf16 %v1605_v8, %v1605_v8  ;;  %v1611_v17 = vpack.c.bf16 %v1607_v9, %v1607_v9 }
 0x1dd   :  { %v1610_v14 = vpack.c.bf16 %v1606_v12, %v1606_v12  ;;  %v1612_v15 = vpack.c.bf16 %v1608_v13, %v1608_v13 }
 0x1df   :  { %1908 = vmatprep.mubr.bf16.mxu0 %v1610_v14  ;;  %1948 = vmatprep.mubr.bf16.mxu1 %v1612_v15 }
 0x1e0   :  { %1909 = vmatmul.mubr.bf16.vlgmr.msra.gmra.mrb[4].mxu0 %v1609_v16  ;;  %1949 = vmatmul.mubr.bf16.vlgmr.msra.gmra.mrb[4].mxu1 %v1611_v17 }
 0x2b3   :  { %v2231_v18 = vpop.f32.mrb[4].mxu0  ;;  %v2253_v19 = vpop.f32.mrb[4].mxu1 }
 0x2b4   :  { %v2232_v21 = vpop.f32.mrb[5].mxu0  ;;  %v2254_v22 = vpop.f32.mrb[5].mxu1 }
 0x2b5   :  { %v2233_v23 = vadd.f32 %v2232_v21, %v2231_v18  ;;  %v2255_v24 = vadd.f32 %v2254_v22, %v2253_v19  ;;  %v2234_v25 = vpop.f32.mrb[6].mxu0  ;;  %v2256_v26 = vpop.f32.mrb[6].mxu1 }
 0x2b6   :  { %v2235_v27 = vpop.f32.mrb[7].mxu0  ;;  %v2257_v28 = vpop.f32.mrb[7].mxu1 }
 0x2b7   :  { %v1911_v29 = vadd.f32 %v2233_v23, %v2182_v20 }
 0x2b9   :  { %v1951_v30 = vadd.f32 %v2255_v24, %v1911_v29 }
 0x2bb   :  { %1956 = vmax.xlane.f32.xlu0 %v1951_v30 }
 0x348   :  { %v1957_v31 = vpop.xlane.xlu0 %1956 }
 0x349   :  { %v1958_v32 = vsub.f32 %v1951_v30, %v1957_v31 }
 0x34b   :  { %v1959_v33 = vmul.f32 1.442695, %v1958_v32 }
 0x34d   :  { %2622 = vpow2.f32 %v1959_v33 }
 0x357   :  { %v2623_v34 = vpop.eup %2622 }
 0x358   :  { %1961 = vadd.xlane.f32.xlu0 %v2623_v34 }
 0x3e5   :  { %v1962_v35 = vpop.xlane.xlu0 %1961 }
 0x3e6   :  { %2624 = vlog2.f32 %v1962_v35 }
 0x3f0   :  { %v2625_v36 = vpop.eup %2624 }
 0x3f1   :  { %v1964_v37 = vmul.f32 0.6931472, %v2625_v36 }
 0x3f3   :  { %v1965_v38 = vsub.f32 %v1958_v32, %v1964_v37 }
 0x3f5   :  { %v1966_v39 = vpack.c.bf16 %v1965_v38, %v1965_v38 }
 0x3f7   :  { %1967 = vst [vmem:[#allocation8] sm:$0xf] %v1966_v39 }
 0x3f8   :  { %2703 = shalt.err (!%p2700_p0)
}
 0x3f9   :  { %s2704_s12 = scalar_lea.hbm %s2818_s5, 64 }
 0x3fa   :  { %p2705_p1 = scmp.ne.s32.totalorder %s2818_s5, %s2704_s12  ;;  %p2708_p2 = scmp.lt.u32.totalorder %s2704_s12, %s2818_s5 }
 0x3fc   :  { %p2710_p3 = pnand %p2708_p2, %p2705_p1 }
 0x3fe   :  { %2713 = shalt.err (!%p2710_p3)
}
 0x3ff   :  { %1977 = dma.vmem_to_hbm [thread:$0]  %s1975_s8, 64, %s2818_s5, [#allocation4]  }
 0x400   :  { %2718 = dma.done.wait [#allocation4], 64  }
 0x401   :  { %2719 = vsyncadd [#allocation4], 4294967232 }
 0x402   :  { %1981 = vsyncpa [#allocation3], 1 }
 0x403   :  { %1982 = vsyncpa [#allocation6], 1 }
 0x404   :  { %1983 = vsyncpa [#allocation4], 1 }

</bundles_post_ra>
